<compile_context>
chip_gen: v7x
topology: tpu7x:2x2x1
jax: 0.10.0
libtpu: 0.0.40
codegen_flags: <defaults>
</compile_context>

<pallas_src>
import functools
import math

import jax
import jax.numpy as jnp
import numpy as np
from jax import lax
from jax.experimental import pallas as pl
from jax.experimental.pallas import tpu as pltpu


# ----------------------------- kernel helpers -------------------------------


def _layernorm(x, gamma, beta, eps=1e-5):
    # PyTorch nn.LayerNorm: biased variance over the last dim, eps inside sqrt.
    mu = jnp.mean(x, axis=-1, keepdims=True)
    var = jnp.mean((x - mu) ** 2, axis=-1, keepdims=True)
    return (x - mu) * lax.rsqrt(var + eps) * gamma + beta


# ------------------------------- the kernel ---------------------------------


def encoder_layer_kernel(
    src_full_ref, pos_full_ref, src_q_ref, pos_q_ref,
    wq_ref, wk_ref, wv_ref, bq_ref, bk_ref, bv_ref,
    wo_ref, bo_ref,
    w1_ref, b1_ref, w2_ref, b2_ref,
    g1_ref, be1_ref, g2_ref, be2_ref,
    out_ref,
    *, nhead: int,
):
    f32 = jnp.float32
    bf16 = jnp.bfloat16

    x_full = src_full_ref[0]                 # (S, D)  rows feeding K / V
    kv_in = x_full + pos_full_ref[0]         # with_pos_embed(src, pos) for K
    x_q = src_q_ref[0]                       # (TQ, D) rows handled by this step
    q_in = x_q + pos_q_ref[0]                # with_pos_embed(src, pos) for Q

    kv_in_bf = kv_in.astype(bf16)
    x_full_bf = x_full.astype(bf16)
    q_in_bf = q_in.astype(bf16)

    TQ, D = x_q.shape

    # --- self-attention (PyTorch MultiheadAttention), heads via fori_loop ---
    # 1/sqrt(dh) is already folded into wq/bq in the wrapper.
    def head_body(h, acc):
        q_h = jnp.dot(q_in_bf, wq_ref[h], preferred_element_type=f32) + bq_ref[h]   # (TQ, dh)
        k_h = jnp.dot(kv_in_bf, wk_ref[h], preferred_element_type=f32) + bk_ref[h]  # (S, dh)
        v_h = jnp.dot(x_full_bf, wv_ref[h], preferred_element_type=f32) + bv_ref[h] # (S, dh)

        # scores (TQ, S): contract head dims, bf16 MXU inputs, f32 accumulation
        s = lax.dot_general(
            q_h.astype(bf16), k_h.astype(bf16),
            (((1,), (1,)), ((), ())),
            preferred_element_type=f32,
        )
        m = jnp.max(s, axis=-1, keepdims=True)
        e = jnp.exp(s - m)
        denom = jnp.sum(e, axis=-1, keepdims=True)
        p = e * pl.reciprocal(denom, approx=True)          # softmax, EUP reciprocal

        o_h = jnp.dot(p.astype(bf16), v_h.astype(bf16), preferred_element_type=f32)  # (TQ, dh)
        # concat(heads) @ Wo^T  ==  sum_h o_h @ Wo_h^T  -> no lane-axis concatenate
        return acc + jnp.dot(o_h.astype(bf16), wo_ref[h], preferred_element_type=f32)

    attn = lax.fori_loop(0, nhead, head_body, jnp.zeros((TQ, D), f32))
    attn = attn + bo_ref[...]

    # --- residual + norm1 ---
    x1 = _layernorm(x_q + attn, g1_ref[...], be1_ref[...])

    # --- feed-forward: linear2(relu(linear1(x))) ---
    h1 = jnp.dot(x1.astype(bf16), w1_ref[...], preferred_element_type=f32) + b1_ref[...]
    h1 = jnp.maximum(h1, 0.0)                # relu (module default activation)
    ff = jnp.dot(h1.astype(bf16), w2_ref[...], preferred_element_type=f32) + b2_ref[...]

    # --- residual + norm2 ---
    out_ref[0] = _layernorm(x1 + ff, g2_ref[...], be2_ref[...])


# -------------------------------- wrapper ------------------------------------


def transformer_encoder_layer(src, pos, params, nhead, *, block_q=None):
    """src, pos: (S, B, D) float32.  Returns (S, B, D) float32."""
    S, B, D = src.shape
    F = params["w1"].shape[0]
    assert D % nhead == 0
    dh = D // nhead
    if block_q is None:
        block_q = S                          # at real DETR sizes use e.g. 256
    assert S % block_q == 0
    nq = S // block_q
    scale = 1.0 / math.sqrt(dh)

    f32, bf16 = jnp.float32, jnp.bfloat16

    # PyTorch convention (S, B, D) -> (B, S, D) for the kernel.
    # TODO(synk): transposes could be removed by accepting batch-major inputs.
    x = jnp.transpose(src, (1, 0, 2))
    p = jnp.transpose(pos, (1, 0, 2))

    # Pre-split weights per head so the kernel never slices the lane axis.
    def split_in_proj(w, s=1.0):
        # torch Linear weight (D_out, D_in); per-head right-multiplier (H, D, dh)
        return (w.T * s).reshape(D, nhead, dh).transpose(1, 0, 2).astype(bf16)

    wq3 = split_in_proj(params["wq"], scale)           # scale folded into Wq
    wk3 = split_in_proj(params["wk"])
    wv3 = split_in_proj(params["wv"])
    wo3 = params["wo"].T.reshape(nhead, dh, D).astype(bf16)
    bq3 = (params["bq"] * scale).reshape(nhead, 1, dh).astype(f32)
    bk3 = params["bk"].reshape(nhead, 1, dh).astype(f32)
    bv3 = params["bv"].reshape(nhead, 1, dh).astype(f32)
    w1_t = params["w1"].T.astype(bf16)                 # (D, F)
    w2_t = params["w2"].T.astype(bf16)                 # (F, D)
    row = lambda a: a.reshape(1, -1).astype(f32)       # 1-D params -> (1, N), f32

    const2d = lambda shp: pl.BlockSpec(shp, lambda b, qi: (0, 0))
    const3d = lambda shp: pl.BlockSpec(shp, lambda b, qi: (0, 0, 0))
    full_seq = pl.BlockSpec((1, S, D), lambda b, qi: (b, 0, 0))
    q_block = pl.BlockSpec((1, block_q, D), lambda b, qi: (b, qi, 0))

    # Advisory cost so XLA schedules surrounding ops around the custom call.
    flops = 2 * B * S * D * (4 * D + 2 * S + 2 * F)
    cost = pl.CostEstimate(
        flops=int(flops),
        transcendentals=int(B * nhead * S * S + 4 * B * S),
        bytes_accessed=int(4 * 3 * B * S * D + 2 * (4 * D * D + 2 * D * F)),
    )

    kernel = functools.partial(encoder_layer_kernel, nhead=nhead)

    out = pl.pallas_call(
        kernel,
        out_shape=jax.ShapeDtypeStruct((B, S, D), f32),
        grid=(B, nq),
        in_specs=[
            full_seq, full_seq,                              # src, pos (full rows -> K, V)
            q_block, q_block,                                # src, pos (query-row block)
            const3d((nhead, D, dh)), const3d((nhead, D, dh)), const3d((nhead, D, dh)),
            const3d((nhead, 1, dh)), const3d((nhead, 1, dh)), const3d((nhead, 1, dh)),
            const3d((nhead, dh, D)), const2d((1, D)),        # wo, bo
            const2d((D, F)), const2d((1, F)),                # w1_t, b1
            const2d((F, D)), const2d((1, D)),                # w2_t, b2
            const2d((1, D)), const2d((1, D)),                # norm1 gamma, beta
            const2d((1, D)), const2d((1, D)),                # norm2 gamma, beta
        ],
        out_specs=q_block,
        compiler_params=pltpu.CompilerParams(
            dimension_semantics=("parallel", "parallel"),
            # tune per chip (<=64 MiB on v7x, up to ~100 MiB on v5e/v6e)
            vmem_limit_bytes=64 * 1024 * 1024,
        ),
        cost_estimate=cost,
    )(
        x, p, x, p,
        wq3, wk3, wv3, bq3, bk3, bv3,
        wo3, row(params["bo"]),
        w1_t, row(params["b1"]),
        w2_t, row(params["b2"]),
        row(params["g1"]), row(params["be1"]),
        row(params["g2"]), row(params["be2"]),
    )
    return jnp.transpose(out, (1, 0, 2))


# ------------------------- pure-JAX reference (sanity) -----------------------


def reference_forward(src, pos, params, nhead):
    S, B, D = src.shape
    dh = D // nhead
    scale = 1.0 / np.sqrt(dh)

    x = jnp.transpose(src, (1, 0, 2))    # (B, S, D)
    p = jnp.transpose(pos, (1, 0, 2))
    qk_in = x + p

    q = qk_in @ params["wq"].T + params["bq"]
    k = qk_in @ params["wk"].T + params["bk"]
    v = x @ params["wv"].T + params["bv"]

    def split(t):  # (B, S, D) -> (B, H, S, dh)
        return jnp.transpose(t.reshape(B, S, nhead, dh), (0, 2, 1, 3))

    qh, kh, vh = split(q) * scale, split(k), split(v)
    scores = jnp.einsum("bhqd,bhkd->bhqk", qh, kh)
    probs = jax.nn.softmax(scores, axis=-1)
    attn = jnp.einsum("bhqk,bhkd->bhqd", probs, vh)
    attn = jnp.transpose(attn, (0, 2, 1, 3)).reshape(B, S, D)
    attn = attn @ params["wo"].T + params["bo"]

    def ln(t, g, b, eps=1e-5):
        mu = jnp.mean(t, axis=-1, keepdims=True)
        var = jnp.mean((t - mu) ** 2, axis=-1, keepdims=True)
        return (t - mu) / jnp.sqrt(var + eps) * g + b

    x = ln(x + attn, params["g1"], params["be1"])
    ff = jnp.maximum(x @ params["w1"].T + params["b1"], 0.0) @ params["w2"].T + params["b2"]
    x = ln(x + ff, params["g2"], params["be2"])
    return jnp.transpose(x, (1, 0, 2))


# ----------------------------------- main ------------------------------------


if __name__ == "__main__":
    S, B, D, H, FF = 8, 2, 32, 4, 64     # seq, batch, d_model, nhead, dim_feedforward

    key = jax.random.PRNGKey(0)
    keys = jax.random.split(key, 16)

    def w(k, shape, s=0.05):
        return (s * jax.random.normal(k, shape)).astype(jnp.float32)

    params = {
        # MultiheadAttention in_proj split into q/k/v and out_proj
        "wq": w(keys[0], (D, D)), "bq": w(keys[1], (D,)),
        "wk": w(keys[2], (D, D)), "bk": w(keys[3], (D,)),
        "wv": w(keys[4], (D, D)), "bv": w(keys[5], (D,)),
        "wo": w(keys[6], (D, D)), "bo": w(keys[7], (D,)),
        # feed-forward
        "w1": w(keys[8], (FF, D)), "b1": w(keys[9], (FF,)),
        "w2": w(keys[10], (D, FF)), "b2": w(keys[11], (D,)),
        # layer norms
        "g1": jnp.ones((D,), jnp.float32), "be1": jnp.zeros((D,), jnp.float32),
        "g2": jnp.ones((D,), jnp.float32), "be2": jnp.zeros((D,), jnp.float32),
    }

    src = jax.random.normal(keys[12], (S, B, D), dtype=jnp.float32)
    pos = jax.random.normal(keys[13], (S, B, D), dtype=jnp.float32)

    out = transformer_encoder_layer(src, pos, params, H)
    out = jax.block_until_ready(out)

    ref = reference_forward(src, pos, params, H)
    # bf16 MXU inputs + approx reciprocal -> relaxed tolerance vs the f32 reference
    np.testing.assert_allclose(np.asarray(out), np.asarray(ref), rtol=2e-2, atol=2e-2)

    print("KERNEL_OK")
</pallas_src>

<mosaic_0001>
module attributes {stable_mosaic.version = 11 : i64} {
  func.func @encoder_layer_kernel(%arg0: i32, %arg1: i32, %arg2: memref<1x8x32xf32, #tpu.memory_space<vmem>>, %arg3: memref<1x8x32xf32, #tpu.memory_space<vmem>>, %arg4: memref<1x8x32xf32, #tpu.memory_space<vmem>>, %arg5: memref<1x8x32xf32, #tpu.memory_space<vmem>>, %arg6: memref<4x32x8xbf16, #tpu.memory_space<vmem>>, %arg7: memref<4x32x8xbf16, #tpu.memory_space<vmem>>, %arg8: memref<4x32x8xbf16, #tpu.memory_space<vmem>>, %arg9: memref<4x1x8xf32, #tpu.memory_space<vmem>>, %arg10: memref<4x1x8xf32, #tpu.memory_space<vmem>>, %arg11: memref<4x1x8xf32, #tpu.memory_space<vmem>>, %arg12: memref<4x8x32xbf16, #tpu.memory_space<vmem>>, %arg13: memref<1x32xf32, #tpu.memory_space<vmem>>, %arg14: memref<32x64xbf16, #tpu.memory_space<vmem>>, %arg15: memref<1x64xf32, #tpu.memory_space<vmem>>, %arg16: memref<64x32xbf16, #tpu.memory_space<vmem>>, %arg17: memref<1x32xf32, #tpu.memory_space<vmem>>, %arg18: memref<1x32xf32, #tpu.memory_space<vmem>>, %arg19: memref<1x32xf32, #tpu.memory_space<vmem>>, %arg20: memref<1x32xf32, #tpu.memory_space<vmem>>, %arg21: memref<1x32xf32, #tpu.memory_space<vmem>>, %arg22: memref<1x8x32xf32, #tpu.memory_space<vmem>>) attributes {dimension_semantics = [#tpu.dimension_semantics<parallel>, #tpu.dimension_semantics<parallel>], iteration_bounds = array<i64: 2, 1>, scalar_prefetch = 0 : i64, scratch_operands = 0 : i64, tpu.core_type = #tpu.core_type<tc>, window_params = [{transform_indices = @transform_0, window_bounds = array<i64: 1, 8, 32>}, {transform_indices = @transform_1, window_bounds = array<i64: 1, 8, 32>}, {transform_indices = @transform_2, window_bounds = array<i64: 1, 8, 32>}, {transform_indices = @transform_3, window_bounds = array<i64: 1, 8, 32>}, {pipeline_mode = #tpu.pipeline_mode<synchronous>, transform_indices = @transform_4, window_bounds = array<i64: 4, 32, 8>}, {pipeline_mode = #tpu.pipeline_mode<synchronous>, transform_indices = @transform_5, window_bounds = array<i64: 4, 32, 8>}, {pipeline_mode = #tpu.pipeline_mode<synchronous>, transform_indices = @transform_6, window_bounds = array<i64: 4, 32, 8>}, {pipeline_mode = #tpu.pipeline_mode<synchronous>, transform_indices = @transform_7, window_bounds = array<i64: 4, 1, 8>}, {pipeline_mode = #tpu.pipeline_mode<synchronous>, transform_indices = @transform_8, window_bounds = array<i64: 4, 1, 8>}, {pipeline_mode = #tpu.pipeline_mode<synchronous>, transform_indices = @transform_9, window_bounds = array<i64: 4, 1, 8>}, {pipeline_mode = #tpu.pipeline_mode<synchronous>, transform_indices = @transform_10, window_bounds = array<i64: 4, 8, 32>}, {pipeline_mode = #tpu.pipeline_mode<synchronous>, transform_indices = @transform_11, window_bounds = array<i64: 1, 32>}, {pipeline_mode = #tpu.pipeline_mode<synchronous>, transform_indices = @transform_12, window_bounds = array<i64: 32, 64>}, {pipeline_mode = #tpu.pipeline_mode<synchronous>, transform_indices = @transform_13, window_bounds = array<i64: 1, 64>}, {pipeline_mode = #tpu.pipeline_mode<synchronous>, transform_indices = @transform_14, window_bounds = array<i64: 64, 32>}, {pipeline_mode = #tpu.pipeline_mode<synchronous>, transform_indices = @transform_15, window_bounds = array<i64: 1, 32>}, {pipeline_mode = #tpu.pipeline_mode<synchronous>, transform_indices = @transform_16, window_bounds = array<i64: 1, 32>}, {pipeline_mode = #tpu.pipeline_mode<synchronous>, transform_indices = @transform_17, window_bounds = array<i64: 1, 32>}, {pipeline_mode = #tpu.pipeline_mode<synchronous>, transform_indices = @transform_18, window_bounds = array<i64: 1, 32>}, {pipeline_mode = #tpu.pipeline_mode<synchronous>, transform_indices = @transform_19, window_bounds = array<i64: 1, 32>}, {transform_indices = @transform_20, window_bounds = array<i64: 1, 8, 32>}]} {
    %c0 = arith.constant 0 : index
    %c0_0 = arith.constant 0 : index
    %c0_1 = arith.constant 0 : index
    %0 = vector.load %arg2[%c0, %c0_0, %c0_1] : memref<1x8x32xf32, #tpu.memory_space<vmem>>, vector<1x8x32xf32>
    %1 = vector.shape_cast %0 : vector<1x8x32xf32> to vector<8x32xf32>
    %c0_2 = arith.constant 0 : index
    %c0_3 = arith.constant 0 : index
    %c0_4 = arith.constant 0 : index
    %2 = vector.load %arg3[%c0_2, %c0_3, %c0_4] : memref<1x8x32xf32, #tpu.memory_space<vmem>>, vector<1x8x32xf32>
    %3 = vector.shape_cast %2 : vector<1x8x32xf32> to vector<8x32xf32>
    %4 = arith.addf %1, %3 : vector<8x32xf32>
    %c0_5 = arith.constant 0 : index
    %c0_6 = arith.constant 0 : index
    %c0_7 = arith.constant 0 : index
    %5 = vector.load %arg4[%c0_5, %c0_6, %c0_7] : memref<1x8x32xf32, #tpu.memory_space<vmem>>, vector<1x8x32xf32>
    %6 = vector.shape_cast %5 : vector<1x8x32xf32> to vector<8x32xf32>
    %c0_8 = arith.constant 0 : index
    %c0_9 = arith.constant 0 : index
    %c0_10 = arith.constant 0 : index
    %7 = vector.load %arg5[%c0_8, %c0_9, %c0_10] : memref<1x8x32xf32, #tpu.memory_space<vmem>>, vector<1x8x32xf32>
    %8 = vector.shape_cast %7 : vector<1x8x32xf32> to vector<8x32xf32>
    %9 = arith.addf %6, %8 : vector<8x32xf32>
    %10 = arith.truncf %4 : vector<8x32xf32> to vector<8x32xbf16>
    %11 = arith.truncf %1 : vector<8x32xf32> to vector<8x32xbf16>
    %12 = arith.truncf %9 : vector<8x32xf32> to vector<8x32xbf16>
    %cst = arith.constant 0.000000e+00 : f32
    %13 = vector.broadcast %cst : f32 to vector<8x32xf32>
    %c0_i32 = arith.constant 0 : i32
    %c4_i32 = arith.constant 4 : i32
    %14 = arith.addi %c0_i32, %c4_i32 : i32
    %c1_i32 = arith.constant 1 : i32
    %15 = scf.for %arg23 = %c0_i32 to %14 step %c1_i32 iter_args(%arg24 = %13) -> (vector<8x32xf32>)  : i32 {
      %86 = arith.index_cast %arg23 : i32 to index
      %c0_46 = arith.constant 0 : index
      %c0_47 = arith.constant 0 : index
      %87 = vector.load %arg6[%86, %c0_46, %c0_47] : memref<4x32x8xbf16, #tpu.memory_space<vmem>>, vector<1x32x8xbf16>
      %88 = vector.shape_cast %87 : vector<1x32x8xbf16> to vector<32x8xbf16>
      %cst_48 = arith.constant dense<0.000000e+00> : vector<8x8xf32>
      %89 = tpu.matmul %12, %88, %cst_48 {dimension_numbers = #tpu.dot_dimension_numbers<[1], [0], [0], [1], [0, 0, 1, 1], [], []>} : vector<8x32xbf16>, vector<32x8xbf16>, vector<8x8xf32> -> vector<8x8xf32>
      %90 = arith.index_cast %arg23 : i32 to index
      %c0_49 = arith.constant 0 : index
      %c0_50 = arith.constant 0 : index
      %91 = vector.load %arg9[%90, %c0_49, %c0_50] : memref<4x1x8xf32, #tpu.memory_space<vmem>>, vector<1x1x8xf32>
      %92 = vector.shape_cast %91 : vector<1x1x8xf32> to vector<1x8xf32>
      %93 = vector.broadcast %92 : vector<1x8xf32> to vector<8x8xf32>
      %94 = arith.addf %89, %93 : vector<8x8xf32>
      %95 = arith.index_cast %arg23 : i32 to index
      %c0_51 = arith.constant 0 : index
      %c0_52 = arith.constant 0 : index
      %96 = vector.load %arg7[%95, %c0_51, %c0_52] : memref<4x32x8xbf16, #tpu.memory_space<vmem>>, vector<1x32x8xbf16>
      %97 = vector.shape_cast %96 : vector<1x32x8xbf16> to vector<32x8xbf16>
      %cst_53 = arith.constant dense<0.000000e+00> : vector<8x8xf32>
      %98 = tpu.matmul %10, %97, %cst_53 {dimension_numbers = #tpu.dot_dimension_numbers<[1], [0], [0], [1], [0, 0, 1, 1], [], []>} : vector<8x32xbf16>, vector<32x8xbf16>, vector<8x8xf32> -> vector<8x8xf32>
      %99 = arith.index_cast %arg23 : i32 to index
      %c0_54 = arith.constant 0 : index
      %c0_55 = arith.constant 0 : index
      %100 = vector.load %arg10[%99, %c0_54, %c0_55] : memref<4x1x8xf32, #tpu.memory_space<vmem>>, vector<1x1x8xf32>
      %101 = vector.shape_cast %100 : vector<1x1x8xf32> to vector<1x8xf32>
      %102 = vector.broadcast %101 : vector<1x8xf32> to vector<8x8xf32>
      %103 = arith.addf %98, %102 : vector<8x8xf32>
      %104 = arith.index_cast %arg23 : i32 to index
      %c0_56 = arith.constant 0 : index
      %c0_57 = arith.constant 0 : index
      %105 = vector.load %arg8[%104, %c0_56, %c0_57] : memref<4x32x8xbf16, #tpu.memory_space<vmem>>, vector<1x32x8xbf16>
      %106 = vector.shape_cast %105 : vector<1x32x8xbf16> to vector<32x8xbf16>
      %cst_58 = arith.constant dense<0.000000e+00> : vector<8x8xf32>
      %107 = tpu.matmul %11, %106, %cst_58 {dimension_numbers = #tpu.dot_dimension_numbers<[1], [0], [0], [1], [0, 0, 1, 1], [], []>} : vector<8x32xbf16>, vector<32x8xbf16>, vector<8x8xf32> -> vector<8x8xf32>
      %108 = arith.index_cast %arg23 : i32 to index
      %c0_59 = arith.constant 0 : index
      %c0_60 = arith.constant 0 : index
      %109 = vector.load %arg11[%108, %c0_59, %c0_60] : memref<4x1x8xf32, #tpu.memory_space<vmem>>, vector<1x1x8xf32>
      %110 = vector.shape_cast %109 : vector<1x1x8xf32> to vector<1x8xf32>
      %111 = vector.broadcast %110 : vector<1x8xf32> to vector<8x8xf32>
      %112 = arith.addf %107, %111 : vector<8x8xf32>
      %113 = arith.truncf %94 : vector<8x8xf32> to vector<8x8xbf16>
      %114 = arith.truncf %103 : vector<8x8xf32> to vector<8x8xbf16>
      %cst_61 = arith.constant dense<0.000000e+00> : vector<8x8xf32>
      %115 = tpu.matmul %113, %114, %cst_61 {dimension_numbers = #tpu.dot_dimension_numbers<[1], [1], [0], [0], [0, 0, 1, 0], [], []>} : vector<8x8xbf16>, vector<8x8xbf16>, vector<8x8xf32> -> vector<8x8xf32>
      %cst_62 = arith.constant dense<0xFF800000> : vector<8xf32>
      %116 = vector.multi_reduction <maximumf>, %115, %cst_62 [1] : vector<8x8xf32> to vector<8xf32>
      %117 = vector.shape_cast %116 : vector<8xf32> to vector<8x1xf32>
      %118 = vector.broadcast %117 : vector<8x1xf32> to vector<8x8xf32>
      %119 = arith.subf %115, %118 : vector<8x8xf32>
      %120 = math.exp %119 : vector<8x8xf32>
      %cst_63 = arith.constant dense<0.000000e+00> : vector<8xf32>
      %121 = vector.multi_reduction <add>, %120, %cst_63 [1] : vector<8x8xf32> to vector<8xf32>
      %122 = vector.shape_cast %121 : vector<8xf32> to vector<8x1xf32>
      %123 = tpu.reciprocal %122 {approx = true} : vector<8x1xf32> -> vector<8x1xf32>
      %124 = vector.broadcast %123 : vector<8x1xf32> to vector<8x8xf32>
      %125 = arith.mulf %120, %124 : vector<8x8xf32>
      %126 = arith.truncf %125 : vector<8x8xf32> to vector<8x8xbf16>
      %127 = arith.truncf %112 : vector<8x8xf32> to vector<8x8xbf16>
      %cst_64 = arith.constant dense<0.000000e+00> : vector<8x8xf32>
      %128 = tpu.matmul %126, %127, %cst_64 {dimension_numbers = #tpu.dot_dimension_numbers<[1], [0], [0], [1], [0, 0, 1, 1], [], []>} : vector<8x8xbf16>, vector<8x8xbf16>, vector<8x8xf32> -> vector<8x8xf32>
      %129 = arith.truncf %128 : vector<8x8xf32> to vector<8x8xbf16>
      %130 = arith.index_cast %arg23 : i32 to index
      %c0_65 = arith.constant 0 : index
      %c0_66 = arith.constant 0 : index
      %131 = vector.load %arg12[%130, %c0_65, %c0_66] : memref<4x8x32xbf16, #tpu.memory_space<vmem>>, vector<1x8x32xbf16>
      %132 = vector.shape_cast %131 : vector<1x8x32xbf16> to vector<8x32xbf16>
      %cst_67 = arith.constant dense<0.000000e+00> : vector<8x32xf32>
      %133 = tpu.matmul %129, %132, %cst_67 {dimension_numbers = #tpu.dot_dimension_numbers<[1], [0], [0], [1], [0, 0, 1, 1], [], []>} : vector<8x8xbf16>, vector<8x32xbf16>, vector<8x32xf32> -> vector<8x32xf32>
      %134 = arith.addf %arg24, %133 : vector<8x32xf32>
      scf.yield %134 : vector<8x32xf32>
    }
    %c4_i32_11 = arith.constant 4 : i32
    %c0_12 = arith.constant 0 : index
    %c0_13 = arith.constant 0 : index
    %16 = vector.load %arg13[%c0_12, %c0_13] : memref<1x32xf32, #tpu.memory_space<vmem>>, vector<1x32xf32>
    %17 = vector.broadcast %16 : vector<1x32xf32> to vector<8x32xf32>
    %18 = arith.addf %15, %17 : vector<8x32xf32>
    %19 = arith.addf %6, %18 : vector<8x32xf32>
    %c0_14 = arith.constant 0 : index
    %c0_15 = arith.constant 0 : index
    %20 = vector.load %arg18[%c0_14, %c0_15] : memref<1x32xf32, #tpu.memory_space<vmem>>, vector<1x32xf32>
    %c0_16 = arith.constant 0 : index
    %c0_17 = arith.constant 0 : index
    %21 = vector.load %arg19[%c0_16, %c0_17] : memref<1x32xf32, #tpu.memory_space<vmem>>, vector<1x32xf32>
    %cst_18 = arith.constant dense<0.000000e+00> : vector<8xf32>
    %22 = vector.multi_reduction <add>, %19, %cst_18 [1] : vector<8x32xf32> to vector<8xf32>
    %23 = vector.shape_cast %22 : vector<8xf32> to vector<8x1xf32>
    %cst_19 = arith.constant 3.200000e+01 : f32
    %24 = vector.broadcast %cst_19 : f32 to vector<8x1xf32>
    %25 = arith.divf %23, %24 : vector<8x1xf32>
    %26 = vector.broadcast %25 : vector<8x1xf32> to vector<8x32xf32>
    %27 = arith.subf %19, %26 : vector<8x32xf32>
    %28 = arith.mulf %27, %27 : vector<8x32xf32>
    %cst_20 = arith.constant dense<0.000000e+00> : vector<8xf32>
    %29 = vector.multi_reduction <add>, %28, %cst_20 [1] : vector<8x32xf32> to vector<8xf32>
    %30 = vector.shape_cast %29 : vector<8xf32> to vector<8x1xf32>
    %cst_21 = arith.constant 3.200000e+01 : f32
    %31 = vector.broadcast %cst_21 : f32 to vector<8x1xf32>
    %32 = arith.divf %30, %31 : vector<8x1xf32>
    %33 = vector.broadcast %25 : vector<8x1xf32> to vector<8x32xf32>
    %34 = arith.subf %19, %33 : vector<8x32xf32>
    %cst_22 = arith.constant 9.99999974E-6 : f32
    %35 = vector.broadcast %cst_22 : f32 to vector<8x1xf32>
    %36 = arith.addf %32, %35 : vector<8x1xf32>
    %37 = math.rsqrt %36 : vector<8x1xf32>
    %38 = vector.broadcast %37 : vector<8x1xf32> to vector<8x32xf32>
    %39 = arith.mulf %34, %38 : vector<8x32xf32>
    %40 = vector.broadcast %20 : vector<1x32xf32> to vector<8x32xf32>
    %41 = arith.mulf %39, %40 : vector<8x32xf32>
    %42 = vector.broadcast %21 : vector<1x32xf32> to vector<8x32xf32>
    %43 = arith.addf %41, %42 : vector<8x32xf32>
    %44 = arith.truncf %43 : vector<8x32xf32> to vector<8x32xbf16>
    %c0_23 = arith.constant 0 : index
    %c0_24 = arith.constant 0 : index
    %45 = vector.load %arg14[%c0_23, %c0_24] : memref<32x64xbf16, #tpu.memory_space<vmem>>, vector<32x64xbf16>
    %cst_25 = arith.constant dense<0.000000e+00> : vector<8x64xf32>
    %46 = tpu.matmul %44, %45, %cst_25 {dimension_numbers = #tpu.dot_dimension_numbers<[1], [0], [0], [1], [0, 0, 1, 1], [], []>} : vector<8x32xbf16>, vector<32x64xbf16>, vector<8x64xf32> -> vector<8x64xf32>
    %c0_26 = arith.constant 0 : index
    %c0_27 = arith.constant 0 : index
    %47 = vector.load %arg15[%c0_26, %c0_27] : memref<1x64xf32, #tpu.memory_space<vmem>>, vector<1x64xf32>
    %48 = vector.broadcast %47 : vector<1x64xf32> to vector<8x64xf32>
    %49 = arith.addf %46, %48 : vector<8x64xf32>
    %cst_28 = arith.constant 0.000000e+00 : f32
    %50 = vector.broadcast %cst_28 : f32 to vector<8x64xf32>
    %51 = arith.maximumf %49, %50 : vector<8x64xf32>
    %52 = arith.truncf %51 : vector<8x64xf32> to vector<8x64xbf16>
    %c0_29 = arith.constant 0 : index
    %c0_30 = arith.constant 0 : index
    %53 = vector.load %arg16[%c0_29, %c0_30] : memref<64x32xbf16, #tpu.memory_space<vmem>>, vector<64x32xbf16>
    %cst_31 = arith.constant dense<0.000000e+00> : vector<8x32xf32>
    %54 = tpu.matmul %52, %53, %cst_31 {dimension_numbers = #tpu.dot_dimension_numbers<[1], [0], [0], [1], [0, 0, 1, 1], [], []>} : vector<8x64xbf16>, vector<64x32xbf16>, vector<8x32xf32> -> vector<8x32xf32>
    %c0_32 = arith.constant 0 : index
    %c0_33 = arith.constant 0 : index
    %55 = vector.load %arg17[%c0_32, %c0_33] : memref<1x32xf32, #tpu.memory_space<vmem>>, vector<1x32xf32>
    %56 = vector.broadcast %55 : vector<1x32xf32> to vector<8x32xf32>
    %57 = arith.addf %54, %56 : vector<8x32xf32>
    %58 = arith.addf %43, %57 : vector<8x32xf32>
    %c0_34 = arith.constant 0 : index
    %c0_35 = arith.constant 0 : index
    %59 = vector.load %arg20[%c0_34, %c0_35] : memref<1x32xf32, #tpu.memory_space<vmem>>, vector<1x32xf32>
    %c0_36 = arith.constant 0 : index
    %c0_37 = arith.constant 0 : index
    %60 = vector.load %arg21[%c0_36, %c0_37] : memref<1x32xf32, #tpu.memory_space<vmem>>, vector<1x32xf32>
    %cst_38 = arith.constant dense<0.000000e+00> : vector<8xf32>
    %61 = vector.multi_reduction <add>, %58, %cst_38 [1] : vector<8x32xf32> to vector<8xf32>
    %62 = vector.shape_cast %61 : vector<8xf32> to vector<8x1xf32>
    %cst_39 = arith.constant 3.200000e+01 : f32
    %63 = vector.broadcast %cst_39 : f32 to vector<8x1xf32>
    %64 = arith.divf %62, %63 : vector<8x1xf32>
    %65 = vector.broadcast %64 : vector<8x1xf32> to vector<8x32xf32>
    %66 = arith.subf %58, %65 : vector<8x32xf32>
    %67 = arith.mulf %66, %66 : vector<8x32xf32>
    %cst_40 = arith.constant dense<0.000000e+00> : vector<8xf32>
    %68 = vector.multi_reduction <add>, %67, %cst_40 [1] : vector<8x32xf32> to vector<8xf32>
    %69 = vector.shape_cast %68 : vector<8xf32> to vector<8x1xf32>
    %cst_41 = arith.constant 3.200000e+01 : f32
    %70 = vector.broadcast %cst_41 : f32 to vector<8x1xf32>
    %71 = arith.divf %69, %70 : vector<8x1xf32>
    %72 = vector.broadcast %64 : vector<8x1xf32> to vector<8x32xf32>
    %73 = arith.subf %58, %72 : vector<8x32xf32>
    %cst_42 = arith.constant 9.99999974E-6 : f32
    %74 = vector.broadcast %cst_42 : f32 to vector<8x1xf32>
    %75 = arith.addf %71, %74 : vector<8x1xf32>
    %76 = math.rsqrt %75 : vector<8x1xf32>
    %77 = vector.broadcast %76 : vector<8x1xf32> to vector<8x32xf32>
    %78 = arith.mulf %73, %77 : vector<8x32xf32>
    %79 = vector.broadcast %59 : vector<1x32xf32> to vector<8x32xf32>
    %80 = arith.mulf %78, %79 : vector<8x32xf32>
    %81 = vector.broadcast %60 : vector<1x32xf32> to vector<8x32xf32>
    %82 = arith.addf %80, %81 : vector<8x32xf32>
    %c0_43 = arith.constant 0 : index
    %c0_44 = arith.constant 0 : index
    %c0_45 = arith.constant 0 : index
    %83 = vector.load %arg22[%c0_43, %c0_44, %c0_45] : memref<1x8x32xf32, #tpu.memory_space<vmem>>, vector<1x8x32xf32>
    %84 = vector.shape_cast %83 : vector<1x8x32xf32> to vector<8x32xf32>
    %85 = vector.shape_cast %82 : vector<8x32xf32> to vector<1x8x32xf32>
    tpu.vector_store %arg22[%c0_43, %c0_44, %c0_45], %85 {strides = array<i32>} : memref<1x8x32xf32, #tpu.memory_space<vmem>>, vector<1x8x32xf32>,
    return
  }
  func.func @transform_0(%arg0: i32, %arg1: i32) -> (i32, i32, i32) {
    %c0_i32 = arith.constant 0 : i32
    %c0_i32_0 = arith.constant 0 : i32
    %c0_i32_1 = arith.constant 0 : i32
    return %arg0, %c0_i32, %c0_i32_0 : i32, i32, i32
  }
  func.func @transform_1(%arg0: i32, %arg1: i32) -> (i32, i32, i32) {
    %c0_i32 = arith.constant 0 : i32
    %c0_i32_0 = arith.constant 0 : i32
    %c0_i32_1 = arith.constant 0 : i32
    return %arg0, %c0_i32, %c0_i32_0 : i32, i32, i32
  }
  func.func @transform_2(%arg0: i32, %arg1: i32) -> (i32, i32, i32) {
    %c0_i32 = arith.constant 0 : i32
    %c0_i32_0 = arith.constant 0 : i32
    return %arg0, %arg1, %c0_i32 : i32, i32, i32
  }
  func.func @transform_3(%arg0: i32, %arg1: i32) -> (i32, i32, i32) {
    %c0_i32 = arith.constant 0 : i32
    %c0_i32_0 = arith.constant 0 : i32
    return %arg0, %arg1, %c0_i32 : i32, i32, i32
  }
  func.func @transform_4(%arg0: i32, %arg1: i32) -> (i32, i32, i32) {
    %c0_i32 = arith.constant 0 : i32
    %c0_i32_0 = arith.constant 0 : i32
    %c0_i32_1 = arith.constant 0 : i32
    %c0_i32_2 = arith.constant 0 : i32
    return %c0_i32, %c0_i32_0, %c0_i32_1 : i32, i32, i32
  }
  func.func @transform_5(%arg0: i32, %arg1: i32) -> (i32, i32, i32) {
    %c0_i32 = arith.constant 0 : i32
    %c0_i32_0 = arith.constant 0 : i32
    %c0_i32_1 = arith.constant 0 : i32
    %c0_i32_2 = arith.constant 0 : i32
    return %c0_i32, %c0_i32_0, %c0_i32_1 : i32, i32, i32
  }
  func.func @transform_6(%arg0: i32, %arg1: i32) -> (i32, i32, i32) {
    %c0_i32 = arith.constant 0 : i32
    %c0_i32_0 = arith.constant 0 : i32
    %c0_i32_1 = arith.constant 0 : i32
    %c0_i32_2 = arith.constant 0 : i32
    return %c0_i32, %c0_i32_0, %c0_i32_1 : i32, i32, i32
  }
  func.func @transform_7(%arg0: i32, %arg1: i32) -> (i32, i32, i32) {
    %c0_i32 = arith.constant 0 : i32
    %c0_i32_0 = arith.constant 0 : i32
    %c0_i32_1 = arith.constant 0 : i32
    %c0_i32_2 = arith.constant 0 : i32
    return %c0_i32, %c0_i32_0, %c0_i32_1 : i32, i32, i32
  }
  func.func @transform_8(%arg0: i32, %arg1: i32) -> (i32, i32, i32) {
    %c0_i32 = arith.constant 0 : i32
    %c0_i32_0 = arith.constant 0 : i32
    %c0_i32_1 = arith.constant 0 : i32
    %c0_i32_2 = arith.constant 0 : i32
    return %c0_i32, %c0_i32_0, %c0_i32_1 : i32, i32, i32
  }
  func.func @transform_9(%arg0: i32, %arg1: i32) -> (i32, i32, i32) {
    %c0_i32 = arith.constant 0 : i32
    %c0_i32_0 = arith.constant 0 : i32
    %c0_i32_1 = arith.constant 0 : i32
    %c0_i32_2 = arith.constant 0 : i32
    return %c0_i32, %c0_i32_0, %c0_i32_1 : i32, i32, i32
  }
  func.func @transform_10(%arg0: i32, %arg1: i32) -> (i32, i32, i32) {
    %c0_i32 = arith.constant 0 : i32
    %c0_i32_0 = arith.constant 0 : i32
    %c0_i32_1 = arith.constant 0 : i32
    %c0_i32_2 = arith.constant 0 : i32
    return %c0_i32, %c0_i32_0, %c0_i32_1 : i32, i32, i32
  }
  func.func @transform_11(%arg0: i32, %arg1: i32) -> (i32, i32) {
    %c0_i32 = arith.constant 0 : i32
    %c0_i32_0 = arith.constant 0 : i32
    %c0_i32_1 = arith.constant 0 : i32
    return %c0_i32, %c0_i32_0 : i32, i32
  }
  func.func @transform_12(%arg0: i32, %arg1: i32) -> (i32, i32) {
    %c0_i32 = arith.constant 0 : i32
    %c0_i32_0 = arith.constant 0 : i32
    %c0_i32_1 = arith.constant 0 : i32
    return %c0_i32, %c0_i32_0 : i32, i32
  }
  func.func @transform_13(%arg0: i32, %arg1: i32) -> (i32, i32) {
    %c0_i32 = arith.constant 0 : i32
    %c0_i32_0 = arith.constant 0 : i32
    %c0_i32_1 = arith.constant 0 : i32
    return %c0_i32, %c0_i32_0 : i32, i32
  }
  func.func @transform_14(%arg0: i32, %arg1: i32) -> (i32, i32) {
    %c0_i32 = arith.constant 0 : i32
    %c0_i32_0 = arith.constant 0 : i32
    %c0_i32_1 = arith.constant 0 : i32
    return %c0_i32, %c0_i32_0 : i32, i32
  }
  func.func @transform_15(%arg0: i32, %arg1: i32) -> (i32, i32) {
    %c0_i32 = arith.constant 0 : i32
    %c0_i32_0 = arith.constant 0 : i32
    %c0_i32_1 = arith.constant 0 : i32
    return %c0_i32, %c0_i32_0 : i32, i32
  }
  func.func @transform_16(%arg0: i32, %arg1: i32) -> (i32, i32) {
    %c0_i32 = arith.constant 0 : i32
    %c0_i32_0 = arith.constant 0 : i32
    %c0_i32_1 = arith.constant 0 : i32
    return %c0_i32, %c0_i32_0 : i32, i32
  }
  func.func @transform_17(%arg0: i32, %arg1: i32) -> (i32, i32) {
    %c0_i32 = arith.constant 0 : i32
    %c0_i32_0 = arith.constant 0 : i32
    %c0_i32_1 = arith.constant 0 : i32
    return %c0_i32, %c0_i32_0 : i32, i32
  }
  func.func @transform_18(%arg0: i32, %arg1: i32) -> (i32, i32) {
    %c0_i32 = arith.constant 0 : i32
    %c0_i32_0 = arith.constant 0 : i32
    %c0_i32_1 = arith.constant 0 : i32
    return %c0_i32, %c0_i32_0 : i32, i32
  }
  func.func @transform_19(%arg0: i32, %arg1: i32) -> (i32, i32) {
    %c0_i32 = arith.constant 0 : i32
    %c0_i32_0 = arith.constant 0 : i32
    %c0_i32_1 = arith.constant 0 : i32
    return %c0_i32, %c0_i32_0 : i32, i32
  }
  func.func @transform_20(%arg0: i32, %arg1: i32) -> (i32, i32, i32) {
    %c0_i32 = arith.constant 0 : i32
    %c0_i32_0 = arith.constant 0 : i32
    return %arg0, %arg1, %c0_i32 : i32, i32, i32
  }
}

</mosaic_0001>

<bundles_post_ra>
// kernel: tpu_custom_call.1
= control target key start
LH: loop header
LB: loop body
LE: loop exit
PB: predicated region body
PF: predicated region fallthrough
CT: control target
= control target key end

     0   :  { %s4022_s0 = inlined_call_operand.hbm [shape: f32[2,8,32], index: 0, kind: input, shape index: {}]   ;;  %s4023_s1 = inlined_call_operand.hbm [shape: f32[2,8,32], index: 1, kind: input, shape index: {}]   ;;  %s4024_s2 = inlined_call_operand.hbm [shape: f32[2,8,32], index: 2, kind: input, shape index: {}]   ;;  %s4025_s3 = inlined_call_operand.hbm [shape: f32[2,8,32], index: 3, kind: input, shape index: {}]   ;;  %s4026_s4 = inlined_call_operand.hbm [shape: bf16[4,32,8], index: 4, kind: input, shape index: {}]   ;;  %s4027_s5 = inlined_call_operand.hbm [shape: bf16[4,32,8], index: 5, kind: input, shape index: {}]   ;;  %s4028_s6 = inlined_call_operand.hbm [shape: bf16[4,32,8], index: 6, kind: input, shape index: {}]   ;;  %s4029_s7 = inlined_call_operand.hbm [shape: f32[4,1,8], index: 7, kind: input, shape index: {}]   ;;  %s4030_s8 = inlined_call_operand.hbm [shape: f32[4,1,8], index: 8, kind: input, shape index: {}]   ;;  %s4031_s9 = inlined_call_operand.hbm [shape: f32[4,1,8], index: 9, kind: input, shape index: {}]   ;;  %s4032_s10 = inlined_call_operand.hbm [shape: bf16[4,8,32], index: 10, kind: input, shape index: {}]   ;;  %s4033_s11 = inlined_call_operand.hbm [shape: f32[1,32], index: 11, kind: input, shape index: {}]   ;;  %s4034_s12 = inlined_call_operand.hbm [shape: bf16[32,64], index: 12, kind: input, shape index: {}]   ;;  %s4035_s13 = inlined_call_operand.hbm [shape: f32[1,64], index: 13, kind: input, shape index: {}]   ;;  %s4036_s14 = inlined_call_operand.hbm [shape: bf16[64,32], index: 14, kind: input, shape index: {}]   ;;  %s4037_s15 = inlined_call_operand.hbm [shape: f32[1,32], index: 15, kind: input, shape index: {}]   ;;  %s4038_s16 = inlined_call_operand.hbm [shape: f32[1,32], index: 16, kind: input, shape index: {}]   ;;  %s4039_s17 = inlined_call_operand.hbm [shape: f32[1,32], index: 17, kind: input, shape index: {}]   ;;  %s4040_s18 = inlined_call_operand.hbm [shape: f32[1,32], index: 18, kind: input, shape index: {}]   ;;  %s4041_s19 = inlined_call_operand.hbm [shape: f32[1,32], index: 19, kind: input, shape index: {}]   ;;  %s4042_s20 = inlined_call_operand.hbm [shape: f32[2,8,32], index: 20, kind: output, shape index: {}]  }
   0x1   :  { %4083 = sst [smem:[#allocation55_spill]] %s4022_s0 }
   0x2   :  { %4084 = sst [smem:[#allocation56_spill]] %s4023_s1 }
   0x3   :  { %4085 = sst [smem:[#allocation57_spill]] %s4024_s2 }
   0x4   :  { %4086 = sst [smem:[#allocation58_spill]] %s4025_s3 }
   0x5   :  { %4087 = sst [smem:[#allocation59_spill]] %s4026_s4 }
   0x6   :  { %4088 = sst [smem:[#allocation60_spill]] %s4027_s5 }
   0x7   :  { %4089 = sst [smem:[#allocation61_spill]] %s4028_s6 }
   0x8   :  { %4090 = sst [smem:[#allocation62_spill]] %s4029_s7 }
   0x9   :  { %4091 = sst [smem:[#allocation63_spill]] %s4030_s8 }
   0xa   :  { %4092 = sst [smem:[#allocation64_spill]] %s4031_s9 }
   0xb   :  { %4093 = sst [smem:[#allocation65_spill]] %s4032_s10 }
   0xc   :  { %4094 = sst [smem:[#allocation66_spill]] %s4033_s11 }
   0xd   :  { %4095 = sst [smem:[#allocation67_spill]] %s4034_s12 }
   0xe   :  { %4096 = sst [smem:[#allocation68_spill]] %s4035_s13 }
   0xf   :  { %4097 = sst [smem:[#allocation69_spill]] %s4036_s14 }
  0x10   :  { %4098 = sst [smem:[#allocation70_spill]] %s4037_s15 }
  0x11   :  { %4099 = sst [smem:[#allocation71_spill]] %s4038_s16 }
  0x12   :  { %4100 = sst [smem:[#allocation72_spill]] %s4039_s17 }
  0x13   :  { %4101 = sst [smem:[#allocation73_spill]] %s4040_s18 }
  0x14   :  { %4102 = sst [smem:[#allocation74_spill]] %s4041_s19 }
  0x15   :  { %4103 = sst [smem:[#allocation75_spill]] %s4042_s20 }
  0x16   :  { %25 = vsyncpa [#allocation3], 0 }
  0x17   :  { %27 = vsyncpa [#allocation3 + $0x1], 0 }
  0x18   :  { %28 = vsyncpa [#allocation6], 0 }
  0x19   :  { %30 = vsyncpa [#allocation6 + $0x1], 0 }
  0x1a   :  { %31 = vsyncpa [#allocation9], 0 }
  0x1b   :  { %33 = vsyncpa [#allocation9 + $0x1], 0 }
  0x1c   :  { %34 = vsyncpa [#allocation12], 0 }
  0x1d   :  { %35 = vsyncpa [#allocation15], 0 }
  0x1e   :  { %36 = vsyncpa [#allocation18], 0 }
  0x1f   :  { %37 = vsyncpa [#allocation21], 0 }
  0x20   :  { %38 = vsyncpa [#allocation24], 0 }
  0x21   :  { %39 = vsyncpa [#allocation27], 0 }
  0x22   :  { %40 = vsyncpa [#allocation30], 0 }
  0x23   :  { %41 = vsyncpa [#allocation33], 0 }
  0x24   :  { %42 = vsyncpa [#allocation4], 0 }
  0x25   :  { %44 = vsyncpa [#allocation4 + $0x1], 0  ;;  %s3238_s1 = smov 0   ;;  %s3240_s22 = smov 0  }
  0x26   :  { %s3242_s23 = smov 0   ;;  %s3244_s24 = smov 0  }
  0x27   :  { %s3246_s2 = smov 0   ;;  %s3248_s25 = smov 0  }
  0x28 LB: > { %4104 = sst [smem:[#allocation48_spill]] %s3074_s1  ;;  %s3269_s3 = sadd.s32 4294967295, %s3094_s25   ;;  %s3094_s25 = sphi %s3248_s25, %s50_s25   ;;  %s3090_s2 = sphi %s3246_s2, %s4185_s2   ;;  %s3086_s24 = sphi %s3244_s24, %s4189_s24   ;;  %s3082_s23 = sphi %s3242_s23, %s4188_s23   ;;  %s3078_s22 = sphi %s3240_s22, %s4187_s22   ;;  %s3074_s1 = sphi %s3238_s1, %s4186_s1  }
  0x29   : > { %4105 = sst [smem:[#allocation49_spill]] %s3086_s24  ;;  %p1935_p0 = scmp.ge.s32.totalorder %s3094_s25, 1 }
  0x2a   : > { %4106 = sst [smem:[#allocation50_spill]] %s3090_s2  ;;  %p4057_p1 = scmp.eq.s32.totalorder %s3269_s3, 0 }
  0x2b   : > { %p539_p2 = scmp.lt.s32.totalorder %s3094_s25, 3  ;;  %s3104_s27 = smov [#allocation10]  }
  0x2c   : > { %s551_s28 = sshll.u32 %s3104_s27, 4  ;;  %s3105_s29 = smov [#allocation11]   ;;  %s3278_s28 = int_to_ptr.vmem [resolvable:$true] %s551_s28 }
  0x2d   : > { %p3274_p3 = pnand %p1935_p0, %p539_p2  ;;  %s564_s30 = sshll.u32 %s3105_s29, 4  ;;  %s3289_s30 = int_to_ptr.vmem [resolvable:$true] %s564_s30 }
  0x2e   : > { %s3106_s0 = smov [#allocation14]   ;;  %s4110_s24 = sld [smem:[#allocation59_spill]] }
  0x2f   : > { %s4107_s26 = scalar_select %p3274_p3, 1, 0 }
  0x30   : > { %p2184_p4 = pneg %p3274_p3  ;;  %s3291_s21 = sshll.u32 %s3106_s0, 4  ;;  %s591_s21 = int_to_ptr.vmem [resolvable:$true] %s3291_s21 }
  0x31   : > { %4108 = sst [smem:[#allocation51_spill]] %s4107_s26 }
  0x32   : > { %p3285_p6 = pnand %p2184_p4, %p4057_p1 }
  0x34   : > { %s4109_s4 = scalar_select %p3285_p6, 1, 0 }
  0x35   : > { %s4111_s19 = smov %s4110_s24  ;;  %s2392_s18 = scalar_lea.hbm %s4110_s24, 1024 }
  0x36   : > { %p2393_p7 = scmp.ne.s32.totalorder %s4111_s19, %s2392_s18  ;;  %p3301_p8 = pneg %p3285_p6 }
  0x37   : > { %p2399_p11 = scmp.lt.u32.totalorder %s2392_s18, %s4111_s19 }
  0x38   : > { %s4112_s14 = scalar_select %p3301_p8, 1, 0 }
  0x39   : > { %p2395_p9 = pnand %p3301_p8, %p2393_p7 }
  0x3b   : > { %p2396_p10 = pneg %p2395_p9 }
  0x3d   : > { %p2401_p12 = pnand %p2399_p11, %p2396_p10 }
  0x3f   : > { %2404 = shalt.err (!%p2401_p12)
}
  0x40   : > { %s2405_s16 = scalar_lea.vmem %s3278_s28, 1024  ;;  %p2413_p4 = scmp.lt.s32.totalorder %s3278_s28, %s3278_s28 }
  0x41   : > { %p2406_p13 = scmp.ne.s32.totalorder %s3278_s28, %s2405_s16  ;;  %p2414_p5 = scmp.lt.s32.totalorder %s2405_s16, %s2405_s16 }
  0x43   : > { %p2408_p0 = pnand %p2406_p13, %p3301_p8  ;;  %p2415_p7 = por %p2414_p5, %p2413_p4 }
  0x45   : > { %p2409_p2 = pneg %p2408_p0 }
  0x47   : > { %p2416_p9 = pnand %p2415_p7, %p2409_p2 }
  0x49   : > { %2419 = shalt.err (!%p2416_p9)
}
  0x4a   : > { %s4059_s20 = smov 64   ;;  %s4061_s18 = smov 4  }
  0x4b   : > { %2187 = dma.hbm_to_vmem [thread:$0]  (!%p3285_p6), %s4111_s19, 1024, %s3278_s28, [#allocation9], %s4059_s20, %s4059_s20, %s4061_s18  }
  0x4c   : > { %s4113_s5 = sld [smem:[#allocation60_spill]] }
  0x52   : > { %s2420_s0 = scalar_lea.hbm %s4113_s5, 1024 }
  0x53   : > { %p2421_p5 = scmp.ne.s32.totalorder %s4113_s5, %s2420_s0  ;;  %p2427_p12 = scmp.lt.u32.totalorder %s2420_s0, %s4113_s5 }
  0x55   : > { %p2423_p10 = pnand %p2421_p5, %p3301_p8 }
  0x57   : > { %p2424_p11 = pneg %p2423_p10 }
  0x59   : > { %p2429_p13 = pnand %p2427_p12, %p2424_p11 }
  0x5b   : > { %2432 = shalt.err (!%p2429_p13)
}
  0x5c   : > { %s2433_s28 = scalar_lea.vmem %s3289_s30, 1024  ;;  %p2441_p7 = scmp.lt.s32.totalorder %s3289_s30, %s3289_s30 }
  0x5d   : > { %p2434_p0 = scmp.ne.s32.totalorder %s3289_s30, %s2433_s28  ;;  %p2442_p9 = scmp.lt.s32.totalorder %s2433_s28, %s2433_s28 }
  0x5f   : > { %p2436_p2 = pnand %p2434_p0, %p3301_p8  ;;  %p2443_p5 = por %p2442_p9, %p2441_p7 }
  0x61   : > { %p2437_p4 = pneg %p2436_p2 }
  0x63   : > { %p2444_p10 = pnand %p2443_p5, %p2437_p4 }
  0x65   : > { %2447 = shalt.err (!%p2444_p10)
}
  0x66   : > { %2190 = dma.hbm_to_vmem [thread:$0]  (!%p3285_p6), %s4113_s5, 1024, %s3289_s30, [#allocation12], %s4059_s20, %s4059_s20, %s4061_s18  }
  0x67   : > { %s4114_s7 = sld [smem:[#allocation62_spill]] }
  0x6d   : > { %s2448_s26 = scalar_lea.hbm %s4114_s7, 64 }
  0x6e   : > { %p2449_p11 = scmp.ne.s32.totalorder %s4114_s7, %s2448_s26  ;;  %p2455_p0 = scmp.lt.u32.totalorder %s2448_s26, %s4114_s7 }
  0x70   : > { %p2451_p12 = pnand %p2449_p11, %p3301_p8 }
  0x72   : > { %p2452_p13 = pneg %p2451_p12 }
  0x74   : > { %p2457_p2 = pnand %p2455_p0, %p2452_p13 }
  0x76   : > { %2460 = shalt.err (!%p2457_p2)
}
  0x77   : > { %s2461_s28 = scalar_lea.vmem %s591_s21, 64  ;;  %p2469_p5 = scmp.lt.s32.totalorder %s591_s21, %s591_s21 }
  0x78   : > { %p2462_p4 = scmp.ne.s32.totalorder %s591_s21, %s2461_s28  ;;  %p2470_p10 = scmp.lt.s32.totalorder %s2461_s28, %s2461_s28 }
  0x7a   : > { %p2464_p7 = pnand %p2462_p4, %p3301_p8  ;;  %p2471_p1 = por %p2470_p10, %p2469_p5 }
  0x7c   : > { %p2465_p9 = pneg %p2464_p7 }
  0x7e   : > { %p2472_p3 = pnand %p2471_p1, %p2465_p9 }
  0x80   : > { %2475 = shalt.err (!%p2472_p3)
}
  0x81   : > { %s4064_s30 = smov 16   ;;  %s4065_s8 = smov 1  }
  0x82   : > { %2196 = dma.hbm_to_vmem [thread:$0]  (!%p3285_p6), %s4114_s7, 64, %s591_s21, [#allocation15], %s4064_s30, %s4064_s30, %s4065_s8  }
  0x83   : > { %s3111_s24 = smov [#allocation17]   ;;  %s3112_s27 = smov [#allocation20]  }
  0x84   : > { %s616_s26 = sshll.u32 %s3111_s24, 4  ;;  %s643_s29 = sshll.u32 %s3112_s27, 4  ;;  %s617_s26 = int_to_ptr.vmem [resolvable:$true] %s616_s26  ;;  %s644_s29 = int_to_ptr.vmem [resolvable:$true] %s643_s29 }
  0x85   : > { %s4115_s9 = sld [smem:[#allocation64_spill]] }
  0x8b   : > { %s2476_s28 = scalar_lea.hbm %s4115_s9, 64 }
  0x8c   : > { %p2477_p1 = scmp.ne.s32.totalorder %s4115_s9, %s2476_s28  ;;  %p2483_p12 = scmp.lt.u32.totalorder %s2476_s28, %s4115_s9 }
  0x8e   : > { %p2479_p3 = pnand %p2477_p1, %p3301_p8 }
  0x90   : > { %p2480_p11 = pneg %p2479_p3 }
  0x92   : > { %p2485_p13 = pnand %p2483_p12, %p2480_p11 }
  0x94   : > { %2488 = shalt.err (!%p2485_p13)
}
  0x95   : > { %s2489_s21 = scalar_lea.vmem %s617_s26, 64  ;;  %p2497_p7 = scmp.lt.s32.totalorder %s617_s26, %s617_s26 }
  0x96   : > { %p2490_p0 = scmp.ne.s32.totalorder %s617_s26, %s2489_s21  ;;  %p2498_p9 = scmp.lt.s32.totalorder %s2489_s21, %s2489_s21 }
  0x98   : > { %p2492_p2 = pnand %p2490_p0, %p3301_p8  ;;  %p2499_p5 = por %p2498_p9, %p2497_p7 }
  0x9a   : > { %p2493_p4 = pneg %p2492_p2 }
  0x9c   : > { %p2500_p10 = pnand %p2499_p5, %p2493_p4 }
  0x9e   : > { %2503 = shalt.err (!%p2500_p10)
}
  0x9f   : > { %2202 = dma.hbm_to_vmem [thread:$0]  (!%p3285_p6), %s4115_s9, 64, %s617_s26, [#allocation18], %s4064_s30, %s4064_s30, %s4065_s8  }
  0xa0   : > { %s4116_s11 = sld [smem:[#allocation66_spill]] }
  0xa6   : > { %s2504_s10 = scalar_lea.hbm %s4116_s11, 16 }
  0xa7   : > { %p2505_p1 = scmp.ne.s32.totalorder %s4116_s11, %s2504_s10  ;;  %p2511_p12 = scmp.lt.u32.totalorder %s2504_s10, %s4116_s11 }
  0xa9   : > { %p2507_p3 = pnand %p2505_p1, %p3301_p8 }
  0xab   : > { %p2508_p11 = pneg %p2507_p3 }
  0xad   : > { %p2513_p13 = pnand %p2511_p12, %p2508_p11 }
  0xaf   : > { %2516 = shalt.err (!%p2513_p13)
}
  0xb0   : > { %s2517_s16 = scalar_lea.vmem %s644_s29, 16  ;;  %s2524_s26 = scalar_lea.vmem %s644_s29, 32 }
  0xb1   : > { %p2518_p0 = scmp.ne.s32.totalorder %s644_s29, %s2517_s16  ;;  %p2525_p7 = scmp.lt.s32.totalorder %s644_s29, %s644_s29 }
  0xb2   : > { %p2526_p9 = scmp.lt.s32.totalorder %s2524_s26, %s2517_s16 }
  0xb3   : > { %p2520_p2 = pnand %p2518_p0, %p3301_p8 }
  0xb4   : > { %p2527_p5 = por %p2526_p9, %p2525_p7 }
  0xb5   : > { %p2521_p4 = pneg %p2520_p2 }
  0xb7   : > { %p2528_p10 = pnand %p2527_p5, %p2521_p4 }
  0xb9   : > { %2531 = shalt.err (!%p2528_p10)
}
  0xba   : > { %2208 = dma.hbm_to_vmem [thread:$0]  (!%p3285_p6), %s4116_s11, 16, %s644_s29, [#allocation21]  }
  0xbb   : > { %s3113_s5 = smov [#allocation23]   ;;  %s3114_s20 = smov [#allocation26]  }
  0xbc   : > { %s667_s19 = sshll.u32 %s3113_s5, 4  ;;  %s691_s18 = sshll.u32 %s3114_s20, 4  ;;  %s668_s19 = int_to_ptr.vmem [resolvable:$true] %s667_s19  ;;  %s692_s18 = int_to_ptr.vmem [resolvable:$true] %s691_s18 }
  0xbd   : > { %s4117_s13 = sld [smem:[#allocation68_spill]] }
  0xc3   : > { %s2532_s24 = scalar_lea.hbm %s4117_s13, 16 }
  0xc4   : > { %p2533_p1 = scmp.ne.s32.totalorder %s4117_s13, %s2532_s24  ;;  %p2539_p12 = scmp.lt.u32.totalorder %s2532_s24, %s4117_s13 }
  0xc6   : > { %p2535_p3 = pnand %p2533_p1, %p3301_p8 }
  0xc8   : > { %p2536_p11 = pneg %p2535_p3 }
  0xca   : > { %p2541_p13 = pnand %p2539_p12, %p2536_p11 }
  0xcc   : > { %2544 = shalt.err (!%p2541_p13)
}
  0xcd   : > { %s2545_s29 = scalar_lea.vmem %s668_s19, 16  ;;  %s2552_s28 = scalar_lea.vmem %s668_s19, 32 }
  0xce   : > { %p2546_p0 = scmp.ne.s32.totalorder %s668_s19, %s2545_s29  ;;  %p2553_p7 = scmp.lt.s32.totalorder %s668_s19, %s668_s19 }
  0xcf   : > { %p2554_p9 = scmp.lt.s32.totalorder %s2552_s28, %s2545_s29 }
  0xd0   : > { %p2548_p2 = pnand %p2546_p0, %p3301_p8 }
  0xd1   : > { %p2555_p5 = por %p2554_p9, %p2553_p7 }
  0xd2   : > { %p2549_p4 = pneg %p2548_p2 }
  0xd4   : > { %p2556_p10 = pnand %p2555_p5, %p2549_p4 }
  0xd6   : > { %2559 = shalt.err (!%p2556_p10)
}
  0xd7   : > { %2214 = dma.hbm_to_vmem [thread:$0]  (!%p3285_p6), %s4117_s13, 16, %s668_s19, [#allocation24]  }
  0xd8   : > { %s4118_s15 = sld [smem:[#allocation70_spill]] }
  0xde   : > { %s2560_s12 = scalar_lea.hbm %s4118_s15, 16 }
  0xdf   : > { %p2561_p1 = scmp.ne.s32.totalorder %s4118_s15, %s2560_s12  ;;  %p2567_p12 = scmp.lt.u32.totalorder %s2560_s12, %s4118_s15 }
  0xe1   : > { %p2563_p3 = pnand %p2561_p1, %p3301_p8 }
  0xe3   : > { %p2564_p11 = pneg %p2563_p3 }
  0xe5   : > { %p2569_p13 = pnand %p2567_p12, %p2564_p11 }
  0xe7   : > { %2572 = shalt.err (!%p2569_p13)
}
  0xe8   : > { %s2573_s26 = scalar_lea.vmem %s692_s18, 16  ;;  %s2580_s19 = scalar_lea.vmem %s692_s18, 32 }
  0xe9   : > { %p2574_p0 = scmp.ne.s32.totalorder %s692_s18, %s2573_s26  ;;  %p2581_p7 = scmp.lt.s32.totalorder %s692_s18, %s692_s18 }
  0xea   : > { %p2582_p9 = scmp.lt.s32.totalorder %s2580_s19, %s2573_s26 }
  0xeb   : > { %p2576_p2 = pnand %p2574_p0, %p3301_p8 }
  0xec   : > { %p2583_p5 = por %p2582_p9, %p2581_p7 }
  0xed   : > { %p2577_p4 = pneg %p2576_p2 }
  0xef   : > { %p2584_p10 = pnand %p2583_p5, %p2577_p4 }
  0xf1   : > { %2587 = shalt.err (!%p2584_p10)
}
  0xf2   : > { %2220 = dma.hbm_to_vmem [thread:$0]  (!%p3285_p6), %s4118_s15, 16, %s692_s18, [#allocation27]  }
  0xf3   : > { %s3115_s21 = smov [#allocation29]   ;;  %s4119_s17 = sld [smem:[#allocation72_spill]] }
  0xf4   : > { %s713_s5 = sshll.u32 %s3115_s21, 4  ;;  %s714_s5 = int_to_ptr.vmem [resolvable:$true] %s713_s5 }
  0xf9   : > { %s2588_s12 = scalar_lea.hbm %s4119_s17, 16 }
  0xfa   : > { %p2589_p1 = scmp.ne.s32.totalorder %s4119_s17, %s2588_s12  ;;  %p2595_p12 = scmp.lt.u32.totalorder %s2588_s12, %s4119_s17 }
  0xfc   : > { %p2591_p3 = pnand %p2589_p1, %p3301_p8 }
  0xfe   : > { %p2592_p11 = pneg %p2591_p3 }
 0x100   : > { %p2597_p13 = pnand %p2595_p12, %p2592_p11 }
 0x102   : > { %2600 = shalt.err (!%p2597_p13)
}
 0x103   : > { %s2601_s18 = scalar_lea.vmem %s714_s5, 16  ;;  %s2608_s26 = scalar_lea.vmem %s714_s5, 32 }
 0x104   : > { %p2602_p0 = scmp.ne.s32.totalorder %s714_s5, %s2601_s18  ;;  %p2609_p7 = scmp.lt.s32.totalorder %s714_s5, %s714_s5 }
 0x105   : > { %p2610_p9 = scmp.lt.s32.totalorder %s2608_s26, %s2601_s18 }
 0x106   : > { %p2604_p2 = pnand %p2602_p0, %p3301_p8 }
 0x107   : > { %p2611_p5 = por %p2610_p9, %p2609_p7 }
 0x108   : > { %p2605_p4 = pneg %p2604_p2 }
 0x10a   : > { %p2612_p10 = pnand %p2611_p5, %p2605_p4 }
 0x10c   : > { %2615 = shalt.err (!%p2612_p10)
}
 0x10d   : > { %2226 = dma.hbm_to_vmem [thread:$0]  (!%p3285_p6), %s4119_s17, 16, %s714_s5, [#allocation30]  }
 0x10e   : > { %s1934_s28 = sadd.s32 4294967294, %s3094_s25   ;;  %s62_s21 = sadd.s32 1, %s3090_s2 }
 0x10f   : > { %p64_p1 = scmp.ge.s32.totalorder %s62_s21, 2  ;;  %s69_s20 = sadd.s32 1, %s3082_s23 }
 0x110   : > { %p76_p3 = scmp.ne.s32.totalorder %s3082_s23, %s3078_s22  ;;  %p77_p11 = scmp.eq.s32.totalorder %s3094_s25, 0 }
 0x111   : > { %s4191_s21 = smov (%p64_p1, %s62_s21), 0  ;;  %p82_p13 = scmp.ne.s32.totalorder %s3078_s22, %s3074_s1 }
 0x112   : > { %4120 = sst [smem:[#allocation52_spill]] %s4191_s21  ;;  %p3474_p12 = por %p77_p11, %p76_p3 }
 0x113   : > { %s66_s5 = ssub.s32 %s3090_s2, %s4191_s21  ;;  %p526_p0 = scmp.eq.s32.totalorder %s3269_s3, 1 }
 0x114   : > { %p67_p2 = scmp.eq.s32.totalorder %s66_s5, 0  ;;  %p4122_p4 = scmp.eq.s32.totalorder %s3269_s3, 0 }
 0x115   : > { %p3489_p9 = por %p526_p0, %p76_p3  ;;  %p532_p5 = scmp.eq.s32.totalorder %s1934_s28, 1 }
 0x116   : > { %p3485_p7 = por %p4122_p4, %p82_p13  ;;  %p2266_p1 = scmp.lt.s32.totalorder %s3094_s25, 2 }
 0x117   : > { %s4124_s24 = scalar_select %p3489_p9, 1, 0 }
 0x118   : > { %s4123_s12 = scalar_select %p3485_p7, 1, 0 }
 0x119   : > { %s3494_s27 = scalar_select %p67_p2, %s3082_s23, %s69_s20  }
 0x11a   : > { %p3496_p10 = por %p532_p5, %p82_p13  ;;  %s4066_s16 = sand.u32 1, %s3082_s23  }
 0x11b   : > { %4125 = sst [smem:[#allocation53_spill]] %s3494_s27  ;;  %s3503_s18 = sshll.u32 %s3090_s2, 7 }
 0x11c   : > { %s4126_s0 = scalar_select %p3496_p10, 1, 0 }
 0x11d   : > { %s3507_s26 = sshll.u32 %s4066_s16, 3  ;;  %p3511_p3 = pnand %p2266_p1, %p3474_p12 }
 0x11e   : > { %4127 = sst [smem:[#allocation54_spill]] %s4126_s0  ;;  %s4068_s29 = sand.u32 1, %s3094_s25  }
 0x11f   : > { %s4128_s19 = scalar_select %p3511_p3, 1, 0 }
 0x120   : > { %s4129_s5 = sld [smem:[#allocation56_spill]]  ;;  %s768_s8 = scalar_lea.vmem [#allocation5], %s3507_s26 }
 0x121   : > { %s775_s16 = sshll.u32 %s768_s8, 4  ;;  %s3527_s10 = scalar_lea.sflag [#allocation6], %s4068_s29  ;;  %s3523_s16 = int_to_ptr.vmem [resolvable:$true] %s775_s16 }
 0x122   : > { %p3533_p12 = pneg %p3511_p3 }
 0x124   : > { %s4130_s9 = scalar_select %p3533_p12, 1, 0 }
 0x126   : > { %s3520_s30 = scalar_lea.hbm %s4129_s5, %s3503_s18  ;;  %s2621_s8 = scalar_lea.hbm %s4129_s5, 256 }
 0x127   : > { %s2616_s7 = scalar_lea.hbm %s3520_s30, 128  ;;  %p2622_p2 = scmp.lt.u32.totalorder %s3520_s30, %s4129_s5 }
 0x128   : > { %p2617_p11 = scmp.ne.s32.totalorder %s3520_s30, %s2616_s7  ;;  %p2623_p4 = scmp.lt.u32.totalorder %s2621_s8, %s2616_s7 }
 0x129   : > { %p2625_p1 = scmp.lt.u32.totalorder %s2616_s7, %s3520_s30 }
 0x12a   : > { %p2619_p13 = pnand %p3533_p12, %p2617_p11  ;;  %p2624_p5 = por %p2623_p4, %p2622_p2 }
 0x12c   : > { %p2620_p0 = pneg %p2619_p13  ;;  %p2626_p10 = por %p2625_p1, %p2624_p5 }
 0x12e   : > { %p2627_p9 = pnand %p2626_p10, %p2620_p0 }
 0x130   : > { %2630 = shalt.err (!%p2627_p9)
}
 0x131   : > { %s2631_s29 = scalar_lea.vmem %s3523_s16, 128  ;;  %s3116_s28 = smov [#allocation5]  }
 0x132   : > { %p2632_p11 = scmp.ne.s32.totalorder %s3523_s16, %s2631_s29  ;;  %s2636_s20 = sshll.u32 %s3116_s28, 4  ;;  %s2637_s20 = int_to_ptr.vmem [resolvable:$false] %s2636_s20 }
 0x133   : > { %s2638_s11 = scalar_lea.vmem %s2637_s20, 256  ;;  %p2639_p6 = scmp.lt.s32.totalorder %s3523_s16, %s2637_s20 }
 0x134   : > { %p2634_p13 = pnand %p2632_p11, %p3533_p12  ;;  %p2640_p8 = scmp.lt.s32.totalorder %s2638_s11, %s2631_s29 }
 0x136   : > { %p2635_p7 = pneg %p2634_p13  ;;  %p2641_p2 = por %p2640_p8, %p2639_p6 }
 0x138   : > { %p2642_p4 = pnand %p2641_p2, %p2635_p7 }
 0x13a   : > { %2645 = shalt.err (!%p2642_p4)
}
 0x13b   : > { %2239 = dma.hbm_to_vmem [thread:$0]  (!%p3511_p3), %s3520_s30, 128, %s3523_s16, %s3527_s10  }
 0x13c   : > { %s3117_s7 = smov [#allocation13]   ;;  %s3118_s8 = smov [#allocation16]  }
 0x13d   : > { %s577_s13 = sshll.u32 %s3117_s7, 4  ;;  %s603_s5 = sshll.u32 %s3118_s8, 4  ;;  %s578_s13 = int_to_ptr.vmem [resolvable:$true] %s577_s13  ;;  %s3557_s5 = int_to_ptr.vmem [resolvable:$true] %s603_s5 }
 0x13e   : > { %s4131_s6 = sld [smem:[#allocation61_spill]]  ;;  %p4132_p8 = scmp.ne.s32.totalorder %s4112_s14, 0 }
 0x144   : > { %s2646_s29 = scalar_lea.hbm %s4131_s6, 1024 }
 0x145   : > { %p2647_p6 = scmp.ne.s32.totalorder %s4131_s6, %s2646_s29  ;;  %p2653_p10 = scmp.lt.u32.totalorder %s2646_s29, %s4131_s6 }
 0x147   : > { %p2649_p7 = pnand %p2647_p6, %p4132_p8 }
 0x149   : > { %p2650_p9 = pneg %p2649_p7 }
 0x14b   : > { %p2655_p0 = pnand %p2653_p10, %p2650_p9 }
 0x14d   : > { %2658 = shalt.err (!%p2655_p0)
}
 0x14e   : > { %s2659_s16 = scalar_lea.vmem %s578_s13, 1024  ;;  %p2667_p13 = scmp.lt.s32.totalorder %s578_s13, %s578_s13 }
 0x14f   : > { %p2660_p5 = scmp.ne.s32.totalorder %s578_s13, %s2659_s16  ;;  %p2668_p2 = scmp.lt.s32.totalorder %s2659_s16, %s2659_s16 }
 0x151   : > { %p2662_p1 = pnand %p2660_p5, %p4132_p8  ;;  %p2669_p4 = por %p2668_p2, %p2667_p13 }
 0x153   : > { %p2663_p11 = pneg %p2662_p1 }
 0x155   : > { %p2670_p3 = pnand %p2669_p4, %p2663_p11 }
 0x157   : > { %2673 = shalt.err (!%p2670_p3)
}
 0x158   : > { %p4133_p6 = scmp.ne.s32.totalorder %s4109_s4, 0  ;;  %s4134_s15 = smov 4  }
 0x159   : > { %s4135_s7 = smov 64   ;;  %s4136_s29 = sld [smem:[#allocation63_spill]] }
 0x15a   : > { %2193 = dma.hbm_to_vmem [thread:$0]  (!%p4133_p6), %s4131_s6, 1024, %s578_s13, [#allocation12], %s4135_s7, %s4135_s7, %s4134_s15  }
 0x15f   : > { %s2674_s11 = scalar_lea.hbm %s4136_s29, 64 }
 0x160   : > { %p2675_p7 = scmp.ne.s32.totalorder %s4136_s29, %s2674_s11  ;;  %p2681_p10 = scmp.lt.u32.totalorder %s2674_s11, %s4136_s29 }
 0x162   : > { %p2677_p3 = pnand %p2675_p7, %p4132_p8 }
 0x164   : > { %p2678_p9 = pneg %p2677_p3 }
 0x166   : > { %p2683_p0 = pnand %p2681_p10, %p2678_p9 }
 0x168   : > { %2686 = shalt.err (!%p2683_p0)
}
 0x169   : > { %s2687_s13 = scalar_lea.vmem %s3557_s5, 64  ;;  %p2695_p13 = scmp.lt.s32.totalorder %s3557_s5, %s3557_s5 }
 0x16a   : > { %p2688_p5 = scmp.ne.s32.totalorder %s3557_s5, %s2687_s13  ;;  %p2696_p2 = scmp.lt.s32.totalorder %s2687_s13, %s2687_s13 }
 0x16c   : > { %p2690_p1 = pnand %p2688_p5, %p4132_p8  ;;  %p2697_p4 = por %p2696_p2, %p2695_p13 }
 0x16e   : > { %p2691_p11 = pneg %p2690_p1 }
 0x170   : > { %p2698_p7 = pnand %p2697_p4, %p2691_p11 }
 0x172   : > { %2701 = shalt.err (!%p2698_p7)
}
 0x173   : > { %s4137_s2 = smov 1   ;;  %s4138_s21 = smov 16  }
 0x174   : > { %2199 = dma.hbm_to_vmem [thread:$0]  (!%p4133_p6), %s4136_s29, 64, %s3557_s5, [#allocation15], %s4138_s21, %s4138_s21, %s4137_s2  }
 0x175   : > { %s3119_s28 = smov [#allocation19]   ;;  %s3120_s11 = smov [#allocation22]  }
 0x176   : > { %s629_s20 = sshll.u32 %s3119_s28, 4  ;;  %s653_s30 = sshll.u32 %s3120_s11, 4  ;;  %s630_s20 = int_to_ptr.vmem [resolvable:$true] %s629_s20  ;;  %s3606_s30 = int_to_ptr.vmem [resolvable:$true] %s653_s30 }
 0x177   : > { %s4139_s6 = sld [smem:[#allocation65_spill]] }
 0x17d   : > { %s2702_s27 = scalar_lea.hbm %s4139_s6, 256 }
 0x17e   : > { %p2703_p3 = scmp.ne.s32.totalorder %s4139_s6, %s2702_s27  ;;  %p2709_p0 = scmp.lt.u32.totalorder %s2702_s27, %s4139_s6 }
 0x180   : > { %p2705_p9 = pnand %p2703_p3, %p4132_p8 }
 0x182   : > { %p2706_p10 = pneg %p2705_p9 }
 0x184   : > { %p2711_p5 = pnand %p2709_p0, %p2706_p10 }
 0x186   : > { %2714 = shalt.err (!%p2711_p5)
}
 0x187   : > { %s2715_s2 = scalar_lea.vmem %s630_s20, 256  ;;  %p2723_p2 = scmp.lt.s32.totalorder %s630_s20, %s630_s20 }
 0x188   : > { %p2716_p1 = scmp.ne.s32.totalorder %s630_s20, %s2715_s2  ;;  %p2724_p4 = scmp.lt.s32.totalorder %s2715_s2, %s2715_s2 }
 0x18a   : > { %p2718_p11 = pnand %p2716_p1, %p4132_p8  ;;  %p2725_p7 = por %p2724_p4, %p2723_p2 }
 0x18c   : > { %p2719_p13 = pneg %p2718_p11 }
 0x18e   : > { %p2726_p12 = pnand %p2725_p7, %p2719_p13 }
 0x190   : > { %2729 = shalt.err (!%p2726_p12)
}
 0x191   : > { %2205 = dma.hbm_to_vmem [thread:$0]  (!%p4133_p6), %s4139_s6, 256, %s630_s20, [#allocation18], %s4135_s7, %s4135_s7, %s4134_s15  }
 0x192   : > { %s4140_s8 = sld [smem:[#allocation67_spill]] }
 0x198   : > { %s2730_s28 = scalar_lea.hbm %s4140_s8, 256 }
 0x199   : > { %p2731_p3 = scmp.ne.s32.totalorder %s4140_s8, %s2730_s28  ;;  %p2737_p10 = scmp.lt.u32.totalorder %s2730_s28, %s4140_s8 }
 0x19b   : > { %p2733_p12 = pnand %p2731_p3, %p4132_p8 }
 0x19d   : > { %p2734_p9 = pneg %p2733_p12 }
 0x19f   : > { %p2739_p0 = pnand %p2737_p10, %p2734_p9 }
 0x1a1   : > { %2742 = shalt.err (!%p2739_p0)
}
 0x1a2   : > { %s2743_s20 = scalar_lea.vmem %s3606_s30, 256  ;;  %p2751_p13 = scmp.lt.s32.totalorder %s3606_s30, %s3606_s30 }
 0x1a3   : > { %p2744_p5 = scmp.ne.s32.totalorder %s3606_s30, %s2743_s20  ;;  %p2752_p2 = scmp.lt.s32.totalorder %s2743_s20, %s2743_s20 }
 0x1a5   : > { %p2746_p1 = pnand %p2744_p5, %p4132_p8  ;;  %p2753_p4 = por %p2752_p2, %p2751_p13 }
 0x1a7   : > { %p2747_p11 = pneg %p2746_p1 }
 0x1a9   : > { %p2754_p7 = pnand %p2753_p4, %p2747_p11 }
 0x1ab   : > { %2757 = shalt.err (!%p2754_p7)
}
 0x1ac   : > { %2211 = dma.hbm_to_vmem [thread:$0]  (!%p4133_p6), %s4140_s8, 256, %s3606_s30, [#allocation21], %s4135_s7, %s4135_s7, %s4134_s15  }
 0x1ad   : > { %s3121_s1 = smov [#allocation25]   ;;  %s3122_s0 = smov [#allocation28]  }
 0x1ae   : > { %s677_s27 = sshll.u32 %s3121_s1, 4  ;;  %s702_s21 = sshll.u32 %s3122_s0, 4  ;;  %s678_s27 = int_to_ptr.vmem [resolvable:$true] %s677_s27  ;;  %s3655_s21 = int_to_ptr.vmem [resolvable:$true] %s702_s21 }
 0x1af   : > { %s4141_s16 = sld [smem:[#allocation69_spill]] }
 0x1b5   : > { %s2758_s13 = scalar_lea.hbm %s4141_s16, 512 }
 0x1b6   : > { %p2759_p3 = scmp.ne.s32.totalorder %s4141_s16, %s2758_s13  ;;  %p2765_p10 = scmp.lt.u32.totalorder %s2758_s13, %s4141_s16 }
 0x1b8   : > { %p2761_p12 = pnand %p2759_p3, %p4132_p8 }
 0x1ba   : > { %p2762_p9 = pneg %p2761_p12 }
 0x1bc   : > { %p2767_p0 = pnand %p2765_p10, %p2762_p9 }
 0x1be   : > { %2770 = shalt.err (!%p2767_p0)
}
 0x1bf   : > { %s2771_s2 = scalar_lea.vmem %s678_s27, 512  ;;  %p2779_p13 = scmp.lt.s32.totalorder %s678_s27, %s678_s27 }
 0x1c0   : > { %p2772_p5 = scmp.ne.s32.totalorder %s678_s27, %s2771_s2  ;;  %p2780_p2 = scmp.lt.s32.totalorder %s2771_s2, %s2771_s2 }
 0x1c2   : > { %p2774_p1 = pnand %p2772_p5, %p4132_p8  ;;  %p2781_p4 = por %p2780_p2, %p2779_p13 }
 0x1c4   : > { %p2775_p11 = pneg %p2774_p1 }
 0x1c6   : > { %p2782_p7 = pnand %p2781_p4, %p2775_p11 }
 0x1c8   : > { %2785 = shalt.err (!%p2782_p7)
}
 0x1c9   : > { %2217 = dma.hbm_to_vmem [thread:$0]  (!%p4133_p6), %s4141_s16, 512, %s678_s27, [#allocation24], %s4135_s7, %s4135_s7, %s4134_s15  }
 0x1ca   : > { %s4142_s13 = sld [smem:[#allocation71_spill]] }
 0x1d0   : > { %s2786_s17 = scalar_lea.hbm %s4142_s13, 16 }
 0x1d1   : > { %p2787_p3 = scmp.ne.s32.totalorder %s4142_s13, %s2786_s17  ;;  %p2793_p10 = scmp.lt.u32.totalorder %s2786_s17, %s4142_s13 }
 0x1d3   : > { %p2789_p12 = pnand %p2787_p3, %p4132_p8 }
 0x1d5   : > { %p2790_p9 = pneg %p2789_p12 }
 0x1d7   : > { %p2795_p0 = pnand %p2793_p10, %p2790_p9 }
 0x1d9   : > { %2798 = shalt.err (!%p2795_p0)
}
 0x1da   : > { %s2799_s15 = scalar_lea.vmem %s3655_s21, 16  ;;  %s2806_s7 = scalar_lea.vmem %s3655_s21, 32 }
 0x1db   : > { %p2800_p5 = scmp.ne.s32.totalorder %s3655_s21, %s2799_s15  ;;  %p2807_p13 = scmp.lt.s32.totalorder %s3655_s21, %s3655_s21 }
 0x1dc   : > { %p2808_p2 = scmp.lt.s32.totalorder %s2806_s7, %s2799_s15 }
 0x1dd   : > { %p2802_p1 = pnand %p2800_p5, %p4132_p8 }
 0x1de   : > { %p2809_p4 = por %p2808_p2, %p2807_p13 }
 0x1df   : > { %p2803_p11 = pneg %p2802_p1 }
 0x1e1   : > { %p2810_p7 = pnand %p2809_p4, %p2803_p11 }
 0x1e3   : > { %2813 = shalt.err (!%p2810_p7)
}
 0x1e4   : > { %2223 = dma.hbm_to_vmem [thread:$0]  (!%p4133_p6), %s4142_s13, 16, %s3655_s21, [#allocation27]  }
 0x1e5   : > { %s3123_s0 = smov [#allocation31]   ;;  %s3124_s11 = smov [#allocation32]  }
 0x1e6   : > { %s724_s28 = sshll.u32 %s3123_s0, 4  ;;  %s735_s17 = sshll.u32 %s3124_s11, 4  ;;  %s725_s28 = int_to_ptr.vmem [resolvable:$true] %s724_s28  ;;  %s3702_s17 = int_to_ptr.vmem [resolvable:$true] %s735_s17 }
 0x1e7   : > { %s4143_s30 = sld [smem:[#allocation73_spill]] }
 0x1ed   : > { %s2814_s2 = scalar_lea.hbm %s4143_s30, 16 }
 0x1ee   : > { %p2815_p3 = scmp.ne.s32.totalorder %s4143_s30, %s2814_s2  ;;  %p2821_p10 = scmp.lt.u32.totalorder %s2814_s2, %s4143_s30 }
 0x1f0   : > { %p2817_p12 = pnand %p2815_p3, %p4132_p8 }
 0x1f2   : > { %p2818_p9 = pneg %p2817_p12 }
 0x1f4   : > { %p2823_p0 = pnand %p2821_p10, %p2818_p9 }
 0x1f6   : > { %2826 = shalt.err (!%p2823_p0)
}
 0x1f7   : > { %s2827_s1 = scalar_lea.vmem %s725_s28, 16  ;;  %s2834_s0 = scalar_lea.vmem %s725_s28, 32 }
 0x1f8   : > { %p2828_p5 = scmp.ne.s32.totalorder %s725_s28, %s2827_s1  ;;  %p2835_p13 = scmp.lt.s32.totalorder %s725_s28, %s725_s28 }
 0x1f9   : > { %p2836_p2 = scmp.lt.s32.totalorder %s2834_s0, %s2827_s1 }
 0x1fa   : > { %p2830_p1 = pnand %p2828_p5, %p4132_p8 }
 0x1fb   : > { %p2837_p4 = por %p2836_p2, %p2835_p13 }
 0x1fc   : > { %p2831_p11 = pneg %p2830_p1 }
 0x1fe   : > { %p2838_p7 = pnand %p2837_p4, %p2831_p11 }
 0x200   : > { %2841 = shalt.err (!%p2838_p7)
}
 0x201   : > { %2229 = dma.hbm_to_vmem [thread:$0]  (!%p4133_p6), %s4143_s30, 16, %s725_s28, [#allocation30]  }
 0x202   : > { %s4144_s15 = sld [smem:[#allocation74_spill]] }
 0x208   : > { %s2842_s7 = scalar_lea.hbm %s4144_s15, 16 }
 0x209   : > { %p2843_p3 = scmp.ne.s32.totalorder %s4144_s15, %s2842_s7  ;;  %p2849_p10 = scmp.lt.u32.totalorder %s2842_s7, %s4144_s15 }
 0x20b   : > { %p2845_p12 = pnand %p2843_p3, %p4132_p8 }
 0x20d   : > { %p2846_p9 = pneg %p2845_p12 }
 0x20f   : > { %p2851_p0 = pnand %p2849_p10, %p2846_p9 }
 0x211   : > { %2854 = shalt.err (!%p2851_p0)
}
 0x212   : > { %s2855_s28 = scalar_lea.vmem %s3702_s17, 16  ;;  %s2862_s11 = scalar_lea.vmem %s3702_s17, 32 }
 0x213   : > { %p2856_p5 = scmp.ne.s32.totalorder %s3702_s17, %s2855_s28  ;;  %p2863_p13 = scmp.lt.s32.totalorder %s3702_s17, %s3702_s17 }
 0x214   : > { %p2864_p2 = scmp.lt.s32.totalorder %s2862_s11, %s2855_s28 }
 0x215   : > { %p2858_p1 = pnand %p2856_p5, %p4132_p8 }
 0x216   : > { %p2865_p4 = por %p2864_p2, %p2863_p13 }
 0x217   : > { %p2859_p11 = pneg %p2858_p1 }
 0x219   : > { %p2866_p7 = pnand %p2865_p4, %p2859_p11 }
 0x21b   : > { %2869 = shalt.err (!%p2866_p7)
}
 0x21c   : > { %2232 = dma.hbm_to_vmem [thread:$0]  (!%p4133_p6), %s4144_s15, 16, %s3702_s17, [#allocation33]  }
 0x21d   : > { %s4145_s7 = sld [smem:[#allocation55_spill]]  ;;  %s750_s21 = scalar_lea.vmem [#allocation2], %s3507_s26 }
 0x21e   : > { %s757_s4 = sshll.u32 %s750_s21, 4  ;;  %s4146_s1 = sand.u32 1, %s3082_s23   ;;  %s758_s4 = int_to_ptr.vmem [resolvable:$true] %s757_s4 }
 0x21f   : > { %s747_s0 = scalar_lea.sflag [#allocation3], %s4146_s1  ;;  %p4147_p3 = scmp.ne.s32.totalorder %s4130_s9, 0 }
 0x223   : > { %s3750_s27 = scalar_lea.hbm %s4145_s7, %s3503_s18  ;;  %s2875_s20 = scalar_lea.hbm %s4145_s7, 256 }
 0x224   : > { %s2870_s28 = scalar_lea.hbm %s3750_s27, 128  ;;  %p2876_p6 = scmp.lt.u32.totalorder %s3750_s27, %s4145_s7 }
 0x225   : > { %p2871_p8 = scmp.ne.s32.totalorder %s3750_s27, %s2870_s28  ;;  %p2877_p10 = scmp.lt.u32.totalorder %s2875_s20, %s2870_s28 }
 0x226   : > { %p2879_p5 = scmp.lt.u32.totalorder %s2870_s28, %s3750_s27 }
 0x227   : > { %p2873_p12 = pnand %p2871_p8, %p4147_p3  ;;  %p2878_p0 = por %p2877_p10, %p2876_p6 }
 0x229   : > { %p2874_p9 = pneg %p2873_p12  ;;  %p2880_p1 = por %p2879_p5, %p2878_p0 }
 0x22b   : > { %p2881_p11 = pnand %p2880_p1, %p2874_p9 }
 0x22d   : > { %2884 = shalt.err (!%p2881_p11)
}
 0x22e   : > { %s2885_s2 = scalar_lea.vmem %s758_s4, 128  ;;  %s3125_s21 = smov [#allocation2]  }
 0x22f   : > { %p2886_p13 = scmp.ne.s32.totalorder %s758_s4, %s2885_s2  ;;  %s2890_s1 = sshll.u32 %s3125_s21, 4  ;;  %s2891_s1 = int_to_ptr.vmem [resolvable:$false] %s2890_s1 }
 0x230   : > { %s2892_s17 = scalar_lea.vmem %s2891_s1, 256  ;;  %p2893_p7 = scmp.lt.s32.totalorder %s758_s4, %s2891_s1 }
 0x231   : > { %p2888_p2 = pnand %p2886_p13, %p4147_p3  ;;  %p2894_p8 = scmp.lt.s32.totalorder %s2892_s17, %s2885_s2 }
 0x233   : > { %p2889_p4 = pneg %p2888_p2  ;;  %p2895_p12 = por %p2894_p8, %p2893_p7 }
 0x235   : > { %p2896_p6 = pnand %p2895_p12, %p2889_p4 }
 0x237   : > { %2899 = shalt.err (!%p2896_p6)
}
 0x238   : > { %p4148_p10 = scmp.ne.s32.totalorder %s4128_s19, 0  ;;  %s4149_s20 = sld [smem:[#allocation57_spill]] }
 0x239   : > { %s786_s14 = scalar_lea.vmem [#allocation7], %s3507_s26 }
 0x23a   : > { %2236 = dma.hbm_to_vmem [thread:$0]  (!%p4148_p10), %s3750_s27, 128, %s758_s4, %s747_s0  }
 0x23b   : > { %s794_s2 = sshll.u32 %s786_s14, 4  ;;  %s795_s2 = int_to_ptr.vmem [resolvable:$true] %s794_s2 }
 0x23e   : > { %s3776_s5 = scalar_lea.hbm %s4149_s20, %s3503_s18  ;;  %s2905_s27 = scalar_lea.hbm %s4149_s20, 256 }
 0x23f   : > { %s2900_s21 = scalar_lea.hbm %s3776_s5, 128  ;;  %p2906_p1 = scmp.lt.u32.totalorder %s3776_s5, %s4149_s20 }
 0x240   : > { %p2901_p9 = scmp.ne.s32.totalorder %s3776_s5, %s2900_s21  ;;  %p2907_p11 = scmp.lt.u32.totalorder %s2905_s27, %s2900_s21 }
 0x241   : > { %p2909_p2 = scmp.lt.u32.totalorder %s2900_s21, %s3776_s5 }
 0x242   : > { %p2903_p0 = pnand %p2901_p9, %p4147_p3  ;;  %p2908_p13 = por %p2907_p11, %p2906_p1 }
 0x244   : > { %p2904_p5 = pneg %p2903_p0  ;;  %p2910_p4 = por %p2909_p2, %p2908_p13 }
 0x246   : > { %p2911_p7 = pnand %p2910_p4, %p2904_p5 }
 0x248   : > { %2914 = shalt.err (!%p2911_p7)
}
 0x249   : > { %s2915_s28 = scalar_lea.vmem %s795_s2, 128  ;;  %s3126_s11 = smov [#allocation7]  }
 0x24a   : > { %p2916_p8 = scmp.ne.s32.totalorder %s795_s2, %s2915_s28  ;;  %s2920_s14 = sshll.u32 %s3126_s11, 4  ;;  %s2921_s14 = int_to_ptr.vmem [resolvable:$false] %s2920_s14 }
 0x24b   : > { %s2922_s1 = scalar_lea.vmem %s2921_s14, 256  ;;  %p2923_p9 = scmp.lt.s32.totalorder %s795_s2, %s2921_s14 }
 0x24c   : > { %p2918_p12 = pnand %p2916_p8, %p4147_p3  ;;  %p2924_p0 = scmp.lt.s32.totalorder %s2922_s1, %s2915_s28 }
 0x24e   : > { %p2919_p6 = pneg %p2918_p12  ;;  %p2925_p10 = por %p2924_p0, %p2923_p9 }
 0x250   : > { %p2926_p1 = pnand %p2925_p10, %p2919_p6 }
 0x252   : > { %2929 = shalt.err (!%p2926_p1)
}
 0x253   : > { %p4150_p11 = scmp.ne.s32.totalorder %s4128_s19, 0  ;;  %s4151_s27 = sld [smem:[#allocation58_spill]] }
 0x254   : > { %s805_s0 = scalar_lea.vmem [#allocation8], %s3507_s26  ;;  %s4152_s11 = sand.u32 1, %s3094_s25  }
 0x255   : > { %2242 = dma.hbm_to_vmem [thread:$0]  (!%p4150_p11), %s3776_s5, 128, %s795_s2, %s3527_s10  }
 0x256   : > { %s813_s28 = sshll.u32 %s805_s0, 4  ;;  %s802_s14 = scalar_lea.sflag [#allocation9], %s4152_s11  ;;  %s814_s28 = int_to_ptr.vmem [resolvable:$true] %s813_s28 }
 0x259   : > { %s3801_s4 = scalar_lea.hbm %s4151_s27, %s3503_s18  ;;  %s2935_s2 = scalar_lea.hbm %s4151_s27, 256 }
 0x25a   : > { %s2930_s1 = scalar_lea.hbm %s3801_s4, 128  ;;  %p2936_p2 = scmp.lt.u32.totalorder %s3801_s4, %s4151_s27 }
 0x25b   : > { %p2931_p10 = scmp.ne.s32.totalorder %s3801_s4, %s2930_s1  ;;  %p2937_p4 = scmp.lt.u32.totalorder %s2935_s2, %s2930_s1 }
 0x25c   : > { %p2939_p8 = scmp.lt.u32.totalorder %s2930_s1, %s3801_s4 }
 0x25d   : > { %p2933_p5 = pnand %p2931_p10, %p4147_p3  ;;  %p2938_p7 = por %p2937_p4, %p2936_p2 }
 0x25f   : > { %p2934_p13 = pneg %p2933_p5  ;;  %p2940_p12 = por %p2939_p8, %p2938_p7 }
 0x261   : > { %p2941_p6 = pnand %p2940_p12, %p2934_p13 }
 0x263   : > { %2944 = shalt.err (!%p2941_p6)
}
 0x264   : > { %s2945_s26 = scalar_lea.vmem %s814_s28, 128  ;;  %s3127_s17 = smov [#allocation8]  }
 0x265   : > { %p2946_p9 = scmp.ne.s32.totalorder %s814_s28, %s2945_s26  ;;  %s2950_s0 = sshll.u32 %s3127_s17, 4  ;;  %s2951_s0 = int_to_ptr.vmem [resolvable:$false] %s2950_s0 }
 0x266   : > { %s2952_s11 = scalar_lea.vmem %s2951_s0, 256  ;;  %p2953_p10 = scmp.lt.s32.totalorder %s814_s28, %s2951_s0 }
 0x267   : > { %p2948_p0 = pnand %p2946_p9, %p4147_p3  ;;  %p2954_p5 = scmp.lt.s32.totalorder %s2952_s11, %s2945_s26 }
 0x269   : > { %p2949_p1 = pneg %p2948_p0  ;;  %p2955_p11 = por %p2954_p5, %p2953_p10 }
 0x26b   : > { %p2956_p2 = pnand %p2955_p11, %p2949_p1 }
 0x26d   : > { %2959 = shalt.err (!%p2956_p2)
}
 0x26e   : > { %p4153_p4 = scmp.ne.s32.totalorder %s4128_s19, 0  ;;  %s4154_s1 = sld [smem:[#allocation51_spill]] }
 0x270   : > { %2245 = dma.hbm_to_vmem [thread:$0]  (!%p4153_p4), %s3801_s4, 128, %s814_s28, %s802_s14  }
 0x274   : > { %p4155_p13 = scmp.ne.s32.totalorder %s4154_s1, 0 }
 0x275   : > { %s3826_s9 = sand.u32 (!%p4155_p13), 1, %s3078_s22   ;;  %p4156_p3 = scmp.ne.s32.totalorder (!%p4155_p13), %s4123_s12, 0 }
 0x276   : > { %822 = sbr.rel (%p4155_p13) target bundleno = 2947 (0xb83), region = 100  ;;  %s3829_s10 = sshll.u32 (!%p4155_p13), %s3826_s9, 3 }
 0x277   : > { %s825_s5 = scalar_lea.sflag (!%p4155_p13), [#allocation3], %s3826_s9  ;;  %s828_s2 = scalar_lea.vmem (!%p4155_p13), [#allocation2], %s3829_s10 }
 0x27d   : > { %3021 = dma.done.wait (%p4156_p3), %s825_s5, 128  }
 0x27e   : > { %3023 = vsyncadd (%p4156_p3), %s825_s5, 4294967168  ;;  %s833_s19 = sand.u32 1, %s3269_s3   ;;  %s837_s28 = scalar_lea.vmem [#allocation5], %s3829_s10 }
 0x27f   : > { %s834_s4 = scalar_lea.sflag [#allocation6], %s833_s19 }
 0x280   : > { %3025 = dma.done.wait (%p4156_p3), %s834_s4, 256  }
 0x281   : > { %3027 = vsyncadd (%p4156_p3), %s834_s4, 4294967040  ;;  %s846_s14 = scalar_lea.vmem [#allocation7], %s3829_s10  ;;  %s852_s18 = scalar_lea.sflag [#allocation9], %s833_s19 }
 0x282   : > { %s855_s21 = scalar_lea.vmem [#allocation8], %s3829_s10 }
 0x283   : > { %3029 = dma.done.wait (%p4156_p3), %s852_s18, 128  }
 0x284   : > { %3031 = vsyncadd (%p4156_p3), %s852_s18, 4294967168  ;;  %p4157_p11 = scmp.eq.s32.totalorder %s3269_s3, 0 }
 0x286   : > { %3033 = dma.done.wait (%p4157_p11), [#allocation9], 1024   ;;  %p4158_p7 = pmov %p4157_p11 }
 0x288   : > { %3035 = vsyncadd (%p4158_p7), [#allocation9], 4294966272  ;;  %p4159_p8 = pmov %p4158_p7 }
 0x289   : > { %p4160_p12 = pmov %p4158_p7 }
 0x28a   : > { %3037 = dma.done.wait (%p4159_p8), [#allocation12], 2048  }
 0x28b   : > { %3039 = vsyncadd (%p4160_p12), [#allocation12], 4294965248  ;;  %p4161_p6 = pmov %p4158_p7 }
 0x28d   : > { %3041 = dma.done.wait (%p4161_p6), [#allocation15], 128   ;;  %p4162_p9 = pmov %p4161_p6 }
 0x28e   : > { %p4163_p0 = pmov %p4161_p6 }
 0x28f   : > { %3043 = vsyncadd (%p4162_p9), [#allocation15], 4294967168 }
 0x290   : > { %3045 = dma.done.wait (%p4163_p0), [#allocation18], 320   ;;  %p4164_p1 = pmov %p4163_p0 }
 0x291   : > { %p4165_p10 = pmov %p4163_p0 }
 0x292   : > { %3047 = vsyncadd (%p4164_p1), [#allocation18], 4294966976 }
 0x293   : > { %3049 = dma.done.wait (%p4165_p10), [#allocation21], 272   ;;  %p4166_p5 = pmov %p4163_p0 }
 0x294   : > { %p4167_p2 = pmov %p4163_p0 }
 0x295   : > { %3051 = vsyncadd (%p4166_p5), [#allocation21], 4294967024 }
 0x296   : > { %3053 = dma.done.wait (%p4167_p2), [#allocation24], 528   ;;  %p4168_p4 = pmov %p4163_p0 }
 0x297   : > { %p4169_p13 = pmov %p4163_p0 }
 0x298   : > { %3055 = vsyncadd (%p4168_p4), [#allocation24], 4294966768 }
 0x299   : > { %3057 = dma.done.wait (%p4169_p13), [#allocation27], 32   ;;  %p4170_p3 = pmov %p4163_p0 }
 0x29a   : > { %p4171_p11 = pmov %p4163_p0 }
 0x29b   : > { %3059 = vsyncadd (%p4170_p3), [#allocation27], 4294967264 }
 0x29c   : > { %3061 = dma.done.wait (%p4171_p11), [#allocation30], 32   ;;  %p4172_p7 = pmov %p4163_p0 }
 0x29d   : > { %p4173_p8 = pmov %p4163_p0 }
 0x29e   : > { %3063 = vsyncadd (%p4172_p7), [#allocation30], 4294967264 }
 0x29f   : > { %3065 = dma.done.wait (%p4173_p8), [#allocation33], 16   ;;  %p4174_p12 = pmov %p4163_p0 }
 0x2a0   : > { %v3887_v0 = vld [vmem:[%s828_s2] sm:$0xff]  ;;  %v993_v1 = vld [vmem:[%s837_s28] sm:$0xff]  ;;  %s990_s3 = scalar_lea.vmem [#allocation34], %s3829_s10  ;;  %v3904_v9 = vmov 0.0   ;;  %s3906_s12 = smov 0  }
 0x2a1   : > { %3067 = vsyncadd (%p4174_p12), [#allocation33], 4294967280  ;;  %v3889_v2 = vld [vmem:[%s846_s14] sm:$0xff]  ;;  %v3892_v3 = vadd.f32 %v993_v1, %v3887_v0  ;;  %v996_v4 = vld [vmem:[%s855_s21] sm:$0xff]  ;;  %v999_v5 = vpack.c.bf16 %v3887_v0, %v3887_v0 }
 0x2a2   : > { %v3897_v6 = vadd.f32 %v996_v4, %v3889_v2 }
 0x2a3   : > { %v998_v7 = vpack.c.bf16 %v3892_v3, %v3892_v3 }
 0x2a4   : > { %v1000_v8 = vpack.c.bf16 %v3897_v6, %v3897_v6 }
 0x2a5 LB: >> { %v3128_v10 = vmov 0.0   ;;  %s3915_s26 = sshll.u32 %s3102_s12, 4  ;;  %vm3129_vm0 = vmmov 0   ;;  %vm1035_vm1 = vcmask 261120   ;;  %s1085_s1 = scalar_lea.vmem [#allocation16], %s3102_s12  ;;  %vm1219_vm2 = vcmask 64512   ;;  %s3102_s12 = sphi %s3906_s12, %s1006_s12   ;;  %v3098_v9 = vphi %v3904_v9, %v4175_v9  }
 0x2a6   : >> { %2056 = vmatprep.subr.bf16.mxu1 %v3128_v10  ;;  %2048 = vmatprep.subr.bf16.mxu0 %v3128_v10  ;;  %s1080_s17 = scalar_lea.vmem [#allocation11], %s3915_s26  ;;  %s1010_s0 = scalar_lea.vmem [#allocation10], %s3915_s26  ;;  %v1990_v15 = vld [vmem:[%s1085_s1] ss:$0 sm:$0xff]  ;;  %vm1282_vm3 = vcmask 1043456  }
 0x2a7   : >> { %2060 = vmatprep.mubr.msk.bf16.mxu1 %vm3129_vm0, %v3128_v10  ;;  %2052 = vmatprep.mubr.msk.bf16.mxu0 %vm3129_vm0, %v3128_v10  ;;  %v2372_v11 = vld [vmem:[%s1080_s17] sm:$0xff]   ;;  %v2373_v12 = vld [vmem:[%s1080_s17 + $0x8] sm:$0xff]   ;;  %s1149_s11 = scalar_lea.vmem [#allocation13], %s3915_s26  ;;  %s1015_s5 = scalar_lea.vmem [#allocation14], %s3102_s12 }
 0x2a8   : >> { %2057 = vmatpush3.bf16.msra.mxu1 %v2372_v11  ;;  %v2374_v13 = vld [vmem:[%s1010_s0] sm:$0xff]   ;;  %v2375_v14 = vld [vmem:[%s1010_s0 + $0x8] sm:$0xff]   ;;  %s1154_s2 = scalar_lea.vmem [#allocation17], %s3102_s12  ;;  %s2001_s19 = sshll.u32 %s3102_s12, 2 }
 0x2a9   : >> { %2058 = vmatprep.subr.bf16.mxu1 %v3128_v10  ;;  %2049 = vmatpush3.bf16.msra.mxu0 %v2374_v13  ;;  %v1985_v20 = vld [vmem:[%s1015_s5] ss:$0 sm:$0xff]  ;;  %v2377_v31 = vld [vmem:[%s1149_s11 + $0x8] sm:$0xff]   ;;  %s1328_s4 = scalar_lea.vmem [#allocation19], %s2001_s19  ;;  %s1006_s12 = sadd.s32 1, %s3102_s12  }
 0x2aa   : >> { %2050 = vmatprep.subr.bf16.mxu0 %v3128_v10  ;;  %v2376_v30 = vld [vmem:[%s1149_s11] sm:$0xff]   ;;  %p1003_p6 = scmp.ge.s32.totalorder %s1006_s12, 4  }
 0x2ab   : >> { %v1995_v45 = vld [vmem:[%s1154_s2] ss:$0 sm:$0xff]  ;;  %vm3131_vm4 = vmmov (%p1003_p6), 0   ;;  %v2383_v0 = vld [vmem:[#allocation22 + $0x8] sm:$0xff] (%p1003_p6)   ;;  %v2385_v3 = vld [vmem:[#allocation25 + $0x8] sm:$0xff] (%p1003_p6)   ;;  %vm1525_vm5 = vcmask (%p1003_p6), 523264  }
 0x2ac   : >> { %2059 = vmatpush3.bf16.msra.mxu1 %v2373_v12  ;;  %v1329_v50 = vld [vmem:[%s1328_s4] sm:$0xf]  ;;  %s4176_s28 = sld [smem:[#allocation49_spill]] (%p1003_p6)  ;;  %s1615_s18 = sshll.u32 (%p1003_p6), %s990_s3, 4  ;;  %s3972_s18 = int_to_ptr.vmem [resolvable:$true] %s1615_s18 }
 0x2ad   : >> { %2072 = vmatprep.subr.bf16.mxu1 %v3128_v10  ;;  %2051 = vmatpush3.bf16.msra.mxu0 %v2375_v14  ;;  %v1334_v51 = vsel %vm1282_vm3, %v1329_v50, 0  ;;  %s4177_s26 = sld [smem:[#allocation75_spill]] (%p1003_p6)  ;;  %s1601_s0 = scalar_lea.sflag (%p1003_p6), [#allocation4], %s3826_s9 }
 0x2ae   : >> { %2064 = vmatprep.subr.bf16.mxu0 %v3128_v10  ;;  %s2960_s11 = scalar_lea.vmem (%p1003_p6), %s3972_s18, 128  ;;  %p4178_p0 = scmp.ne.s32.totalorder (%p1003_p6), %s4124_s24, 0 }
 0x2af   : >> { %2061 = vmatmul.mubr.msk.bf16.vlgmr.msra.gmra.mrb[0].mxu1 %vm1035_vm1, %v998_v7  ;;  %p2961_p9 = scmp.ne.s32.totalorder (%p1003_p6), %s3972_s18, %s2960_s11  ;;  %s3132_s1 = smov (%p1003_p6), [#allocation34]  }
 0x2b0   : >> { %2074 = vmatprep.mubr.msk.bf16.mxu1 %vm3129_vm0, %v3128_v10  ;;  %2053 = vmatmul.mubr.msk.bf16.vlgmr.msra.gmra.mrb[0].mxu0 %vm1035_vm1, %v1000_v8  ;;  %s2964_s5 = sshll.u32 (%p1003_p6), %s3132_s1, 4  ;;  %s2965_s5 = int_to_ptr.vmem [resolvable:$false] %s2964_s5 }
 0x2b1   : >> { %2068 = vmatprep.mubr.msk.bf16.mxu0 %vm3129_vm0, %v3128_v10  ;;  %2065 = vmatpush3.bf16.msra.mxu0 %v2376_v30  ;;  %p2962_p1 = pnand (%p1003_p6), %p2961_p9, %p4178_p0  ;;  %s2966_s2 = scalar_lea.vmem (%p1003_p6), %s2965_s5, 256 }
 0x2b2   : >> { %2066 = vmatprep.subr.bf16.mxu0 %v3128_v10  ;;  %s2019_s14 = sshll.u32 (%p1003_p6), %s4176_s28, 7  ;;  %p2967_p5 = scmp.lt.s32.totalorder (%p1003_p6), %s3972_s18, %s2965_s5 }
 0x2b3   : > { %s3970_s17 = scalar_lea.hbm (%p1003_p6), %s4177_s26, %s2019_s14  ;;  %p2963_p10 = pneg (%p1003_p6), %p2962_p1 }
 0x2b4   : > { %p2968_p2 = scmp.lt.s32.totalorder (%p1003_p6), %s2966_s2, %s2960_s11 }
 0x2b5   : >> { %2067 = vmatpush3.bf16.msra.mxu0 %v2377_v31 }
 0x2b6   : >> { %2078 = vmatprep.subr.bf16.mxu0 %v3128_v10  ;;  %p2969_p4 = por (%p1003_p6), %p2968_p2, %p2967_p5 }
 0x2b8   : >> { %2069 = vmatmul.mubr.msk.bf16.vlgmr.msra.gmra.mrb[4].mxu0 %vm1035_vm1, %v999_v5  ;;  %p2970_p13 = pnand (%p1003_p6), %p2969_p4, %p2963_p10 }
 0x2b9   : >> { %2080 = vmatprep.mubr.msk.bf16.mxu0 %vm3129_vm0, %v3128_v10 }
 0x382   : >> { %v1142_v16 = vpop.f32.mrb[0].mxu1 }
 0x383   : >> { %v1143_v17 = vadd.f32 %v1990_v15, %v1142_v16  ;;  %v2062_v18 = vpop.f32.mrb[1].mxu1  ;;  %v1073_v21 = vpop.f32.mrb[0].mxu0 }
 0x384   : >> { %v1145_v19 = vpop.f32.mrb[2].mxu1  ;;  %v2054_v24 = vpop.f32.mrb[1].mxu0  ;;  %v1074_v27 = vadd.f32 %v1985_v20, %v1073_v21  ;;  %v2382_v18 = vld [vmem:[#allocation22] sm:$0xff] (%p1003_p6)   ;;  %v2004_v20 = vld [vmem:[#allocation28] ss:$0 sm:$0xff] (%p1003_p6) }
 0x385   : >> { %v1218_v22 = vpack.c.bf16 %v1143_v17, %v1143_v17  ;;  %v2063_v23 = vpop.f32.mrb[3].mxu1  ;;  %v1076_v25 = vpop.f32.mrb[2].mxu0  ;;  %v3130_v19 = vmov (%p1003_p6), 0.0  }
 0x386   : >> { %v2055_v28 = vpop.f32.mrb[3].mxu0  ;;  %v1217_v29 = vpack.c.bf16 %v1074_v27, %v1074_v27  ;;  %v2387_v27 = vld [vmem:[#allocation25 + $0x18] sm:$0xff] (%p1003_p6)  }
 0x387   : >> { %v1224_v26 = vsel %vm1219_vm2, %v1218_v22, 0  ;;  %v2005_v22 = vld [vmem:[#allocation29] ss:$0 sm:$0xff] (%p1003_p6)  ;;  %v2006_v28 = vld [vmem:[#allocation23] ss:$0 sm:$0xff] (%p1003_p6) }
 0x388   : >> { %2073 = vmatpush3.bf16.xpose.msra.mxu1 %v1224_v26  ;;  %v2386_v26 = vld [vmem:[#allocation25 + $0x10] sm:$0xff] (%p1003_p6)  }
 0x389   : >> { %2084 = vmatprep.subr.bf16.mxu1 %v3128_v10 }
 0x38b   : >> { %v1211_v42 = vpop.f32.mrb[4].mxu0 }
 0x38c   : >> { %v2070_v43 = vpop.f32.mrb[5].mxu0  ;;  %v1212_v47 = vadd.f32 %v1995_v45, %v1211_v42 }
 0x38d   : >> { %v1214_v44 = vpop.f32.mrb[6].mxu0 }
 0x38e   : >> { %v2071_v46 = vpop.f32.mrb[7].mxu0  ;;  %v1278_v48 = vpack.c.bf16 %v1212_v47, %v1212_v47 }
 0x38f   : >> { %2075 = vmatmul.mubr.msk.bf16.vlgmr.msra.gmra.mrb[4].mxu1 %vm1219_vm2, %v1217_v29 }
 0x390   : >> { %2086 = vmatprep.mubr.msk.bf16.mxu1 %vm3129_vm0, %v3128_v10  ;;  %v1284_v49 = vsel %vm1282_vm3, %v1278_v48, 0  ;;  %2085 = vmatpush3.bf16.msra.mxu1 %v1334_v51  ;;  %v2003_v10 = vld [vmem:[#allocation20] ss:$0 sm:$0xff] (%p1003_p6) }
 0x391   : >> { %2079 = vmatpush3.bf16.msra.mxu0 %v1284_v49  ;;  %2098 = vmatprep.subr.bf16.mxu1 (%p1003_p6), %v3130_v19 }
 0x392   : > { %2090 = vmatprep.subr.bf16.mxu0 (%p1003_p6), %v3130_v19 }
 0x462   : >> { %v1260_v32 = vpop.f32.mrb[4].mxu1 }
 0x463   : >> { %v2076_v33 = vpop.f32.mrb[5].mxu1  ;;  %v1266_v34 = vsel %vm1219_vm2, %v1260_v32, -inf }
 0x464   : >> { %1267 = vmax.xlane.f32.xlu0 %v1266_v34  ;;  %v1263_v35 = vpop.f32.mrb[6].mxu1 }
 0x465   : >> { %v2077_v36 = vpop.f32.mrb[7].mxu1 }
 0x466   : > { %v2010_v36 = vld [vmem:[#allocation26] ss:$0 sm:$0xff] (%p1003_p6) }
 0x4f1   : >> { %v1268_v37 = vpop.xlane.xlu0 %1267 }
 0x4f2   : >> { %v1269_v38 = vsub.f32 %v1260_v32, %v1268_v37 }
 0x4f4   : >> { %v1270_v39 = vmul.f32 1.442695, %v1269_v38 }
 0x4f6   : >> { %2378 = vpow2.f32 %v1270_v39 }
 0x500   : >> { %v2379_v40 = vpop.eup %2378 }
 0x501   : >> { %v1272_v41 = vsel %vm1219_vm2, %v2379_v40, 0.0 }
 0x502   : >> { %1273 = vadd.xlane.f32.xlu0 %v1272_v41 }
 0x58f   : >> { %v1274_v52 = vpop.xlane.xlu0 %1273 }
 0x590   : >> { %2380 = vrcp.f32 %v1274_v52 }
 0x59a   : >> { %v2381_v53 = vpop.eup %2380 }
 0x59b   : >> { %v1276_v54 = vmul.f32 %v2381_v53, %v2379_v40  ;;  %v2016_v53 = vld [vmem:[#allocation31] ss:$0 sm:$0xff] (%p1003_p6) }
 0x59d   : >> { %v1277_v55 = vpack.c.bf16 %v1276_v54, %v1276_v54 }
 0x59f   : >> { %2081 = vmatmul.mubr.msk.bf16.vlgmr.msra.gmra.mrb[8].mxu0 %vm1219_vm2, %v1277_v55  ;;  %v2017_v55 = vld [vmem:[#allocation32] ss:$0 sm:$0xff] (%p1003_p6) }
 0x5a0   : > { %2094 = vmatprep.mubr.msk.bf16.mxu0 (%p1003_p6), %vm3131_vm4, %v3130_v19  ;;  %2091 = vmatpush3.bf16.msra.mxu0 (%p1003_p6), %v2382_v18 }
 0x5a1   : > { %2092 = vmatprep.subr.bf16.mxu0 (%p1003_p6), %v3130_v19 }
 0x5a4   : > { %2093 = vmatpush3.bf16.msra.mxu0 (%p1003_p6), %v2383_v0 }
 0x672   : >> { %v1320_v56 = vpop.f32.mrb[8].mxu0 }
 0x673   : >> { %v1326_v57 = vpack.c.bf16 %v1320_v56, %v1320_v56  ;;  %v2082_v58 = vpop.f32.mrb[9].mxu0 }
 0x674   : >> { %v1323_v59 = vpop.f32.mrb[10].mxu0 }
 0x675   : >> { %v2083_v60 = vpop.f32.mrb[11].mxu0  ;;  %2087 = vmatmul.mubr.msk.bf16.vlgmr.msra.gmra.mrb[8].mxu1 %vm1219_vm2, %v1326_v57 }
 0x676   : > { %2106 = vmatprep.mubr.msk.bf16.mxu1 (%p1003_p6), %vm3131_vm4, %v3130_v19 }
 0x745   : > { %1005 = sbr.rel (!%p1003_p6) target bundleno = 677 (0x2a5), region = 260 }
 0x748   : >> { %v1370_v61 = vpop.f32.mrb[8].mxu1 }
 0x749   : >> { %v1376_v62 = vadd.f32 %v3098_v9, %v1370_v61   ;;  %v2088_v63 = vpop.f32.mrb[9].mxu1 }
 0x74a   : >> { %v1373_v1 = vpop.f32.mrb[10].mxu1 }
 0x74b   : >> { %v2089_v4 = vpop.f32.mrb[11].mxu1  ;;  %v4175_v9 = vmov %v1376_v62  ;;  %v1384_v11 = vadd.f32 (%p1003_p6), %v2003_v10, %v1376_v62 }
 0x74d   : > { %v1385_v12 = vadd.f32 %v1384_v11, %v3889_v2  ;;  %v2384_v2 = vld [vmem:[#allocation25] sm:$0xff]  }
 0x74e   : > { %2099 = vmatpush3.bf16.msra.mxu1 %v2384_v2 }
 0x74f   : > { %v1389_v13 = vsel %vm1035_vm1, %v1385_v12, 0.0  ;;  %2100 = vmatprep.subr.bf16.mxu1 %v3130_v19 }
 0x750   : > { %1390 = vadd.xlane.f32.xlu0 %v1389_v13 }
 0x752   : > { %2101 = vmatpush3.bf16.msra.mxu1 %v2385_v3 }
 0x753   : > { %2102 = vmatprep.subr.bf16.mxu1 %v3130_v19 }
 0x756   : > { %2103 = vmatpush3.bf16.msra.mxu1 %v2386_v26 }
 0x757   : > { %2104 = vmatprep.subr.bf16.mxu1 %v3130_v19 }
 0x75a   : > { %2105 = vmatpush3.bf16.msra.mxu1 %v2387_v27 }
 0x7dd   : > { %v1391_v14 = vpop.xlane.xlu0 %1390 }
 0x7de   : > { %v1393_v9 = vmul.f32 0.03125, %v1391_v14 }
 0x7e0   : > { %v1394_v15 = vsub.f32 %v1385_v12, %v1393_v9 }
 0x7e2   : > { %v1395_v16 = vmul.f32 %v1394_v15, %v1394_v15 }
 0x7e4   : > { %v1396_v17 = vsel %vm1035_vm1, %v1395_v16, 0.0 }
 0x7e5   : > { %1397 = vadd.xlane.f32.xlu0 %v1396_v17 }
 0x872   : > { %v1398_v5 = vpop.xlane.xlu0 %1397 }
 0x873   : > { %v1399_v6 = vmul.f32 0.03125, %v1398_v5 }
 0x875   : > { %v1400_v7 = vadd.f32 1e-05, %v1399_v6 }
 0x877   : > { %2388 = vrsqrt.f32 %v1400_v7 }
 0x881   : > { %v2389_v8 = vpop.eup %2388 }
 0x882   : > { %v1402_v21 = vmul.f32 %v2389_v8, %v1394_v15 }
 0x884   : > { %v1409_v23 = vmul.f32 %v2004_v20, %v1402_v21 }
 0x886   : > { %v1416_v24 = vadd.f32 %v2005_v22, %v1409_v23 }
 0x888   : > { %v1417_v25 = vpack.c.bf16 %v1416_v24, %v1416_v24 }
 0x88a   : > { %2095 = vmatmul.mubr.msk.bf16.vlgmr.msra.gmra.mrb[0].mxu0 %vm1035_vm1, %v1417_v25 }
 0x95d   : > { %v1478_v29 = vpop.f32.mrb[0].mxu0 }
 0x95e   : > { %v1479_v30 = vadd.f32 %v2006_v28, %v1478_v29  ;;  %v2096_v31 = vpop.f32.mrb[1].mxu0 }
 0x95f   : > { %v1481_v32 = vpop.f32.mrb[2].mxu0 }
 0x960   : > { %v1484_v33 = vmax.f32 %v1479_v30, 0.0  ;;  %v2097_v34 = vpop.f32.mrb[3].mxu0 }
 0x962   : > { %v1485_v35 = vpack.c.bf16 %v1484_v33, %v1484_v33 }
 0x964   : > { %2107 = vmatmul.mubr.msk.bf16.vlgmr.msra.gmra.mrb[0].mxu1 %vm1525_vm5, %v1485_v35 }
 0xa37   : > { %v1563_v37 = vpop.f32.mrb[0].mxu1 }
 0xa38   : > { %v1564_v38 = vadd.f32 %v2010_v36, %v1563_v37  ;;  %v2108_v39 = vpop.f32.mrb[1].mxu1 }
 0xa39   : > { %v1566_v40 = vpop.f32.mrb[2].mxu1 }
 0xa3a   : > { %v2109_v41 = vpop.f32.mrb[3].mxu1  ;;  %v1569_v42 = vadd.f32 %v1564_v38, %v1416_v24 }
 0xa3c   : > { %v1572_v43 = vsel %vm1035_vm1, %v1569_v42, 0.0 }
 0xa3d   : > { %1573 = vadd.xlane.f32.xlu1 %v1572_v43 }
 0xaca   : > { %v1574_v44 = vpop.xlane.xlu1 %1573 }
 0xacb   : > { %v1575_v45 = vmul.f32 0.03125, %v1574_v44 }
 0xacd   : > { %v1576_v46 = vsub.f32 %v1569_v42, %v1575_v45 }
 0xacf   : > { %v1577_v47 = vmul.f32 %v1576_v46, %v1576_v46 }
 0xad1   : > { %v1578_v48 = vsel %vm1035_vm1, %v1577_v47, 0.0 }
 0xad2   : > { %1579 = vadd.xlane.f32.xlu1 %v1578_v48 }
 0xb5f   : > { %v1580_v49 = vpop.xlane.xlu1 %1579 }
 0xb60   : > { %v1581_v50 = vmul.f32 0.03125, %v1580_v49 }
 0xb62   : > { %v1582_v51 = vadd.f32 1e-05, %v1581_v50 }
 0xb64   : > { %2390 = vrsqrt.f32 %v1582_v51 }
 0xb6e   : > { %v2391_v52 = vpop.eup %2390 }
 0xb6f   : > { %v1584_v54 = vmul.f32 %v2391_v52, %v1576_v46 }
 0xb71   : > { %v1591_v56 = vmul.f32 %v2016_v53, %v1584_v54 }
 0xb73   : > { %v1598_v57 = vadd.f32 %v2017_v55, %v1591_v56 }
 0xb75   : > { %1599 = vst.msk [vmem:[%s990_s3] sm:$0xff] %vm1035_vm1, %v1598_v57 }
 0xb76   : > { %2973 = shalt.err (!%p2970_p13)
}
 0xb77   : > { %s2974_s9 = scalar_lea.hbm %s3970_s17, 128  ;;  %s2978_s19 = scalar_lea.hbm %s4177_s26, 256 }
 0xb78   : > { %p2975_p3 = scmp.ne.s32.totalorder %s3970_s17, %s2974_s9  ;;  %p2979_p8 = scmp.lt.u32.totalorder %s3970_s17, %s4177_s26 }
 0xb79   : > { %p2980_p12 = scmp.lt.u32.totalorder %s2978_s19, %s2974_s9  ;;  %p2982_p9 = scmp.lt.u32.totalorder %s2974_s9, %s3970_s17 }
 0xb7a   : > { %p2976_p11 = pnand %p2975_p3, %p4178_p0 }
 0xb7b   : > { %p2981_p6 = por %p2980_p12, %p2979_p8 }
 0xb7c   : > { %p2977_p7 = pneg %p2976_p11 }
 0xb7d   : > { %p2983_p1 = por %p2982_p9, %p2981_p6 }
 0xb7f   : > { %p2984_p10 = pnand %p2983_p1, %p2977_p7 }
 0xb81   : > { %2987 = shalt.err (!%p2984_p10)
}
 0xb82   : > { %2182 = dma.vmem_to_hbm [thread:$0]  (%p4178_p0), %s3972_s18, 128, %s3970_s17, %s1601_s0  }
 0xb83 PF: > { %s4179_s14 = sld [smem:[#allocation48_spill]]  ;;  %s4180_s21 = sld [smem:[#allocation54_spill]] }
 0xb84   : > { %p4182_p2 = scmp.ge.s32.totalorder %s3094_s25, 2 }
 0xb89   : > { %s1627_s12 = sand.u32 1, %s4179_s14   ;;  %p4181_p5 = scmp.ne.s32.totalorder %s4180_s21, 0 }
 0xb8a   : > { %s1628_s11 = scalar_lea.sflag [#allocation4], %s1627_s12 }
 0xb8b   : > { %p2247_p4 = pnand %p4182_p2, %p4181_p5 }
 0xb8d   : > { %3069 = dma.done.wait (!%p2247_p4), %s1628_s11, 128  }
 0xb8e   : > { %3071 = vsyncadd (!%p2247_p4), %s1628_s11, 4294967168  ;;  %s50_s25 = sadd.s32 1, %s3094_s25   ;;  %s4183_s24 = sld [smem:[#allocation53_spill]] }
 0xb8f   : > { %p47_p13 = scmp.ge.s32.totalorder %s50_s25, 4   ;;  %s4184_s5 = sld [smem:[#allocation50_spill]] }
 0xb90   : > { %s4185_s2 = sld [smem:[#allocation52_spill]]  ;;  %s4186_s1 = smov %s3078_s22 }
 0xb91   : > { %s4187_s22 = smov %s3082_s23  ;;  %49 = sbr.rel (!%p47_p13) target bundleno = 40 (0x28), region = 271 }
 0xb94   : > { %s4188_s23 = smov %s4183_s24 }
 0xb95   : > { %s4189_s24 = smov %s4184_s5 }
 0xb98   :  { %1633 = vsyncpa [#allocation3], 1 }
 0xb99   :  { %1635 = vsyncpa [#allocation3 + $0x1], 1 }
 0xb9a   :  { %1636 = vsyncpa [#allocation6], 1 }
 0xb9b   :  { %1638 = vsyncpa [#allocation6 + $0x1], 1 }
 0xb9c   :  { %1639 = vsyncpa [#allocation9], 1 }
 0xb9d   :  { %1641 = vsyncpa [#allocation9 + $0x1], 1 }
 0xb9e   :  { %1642 = vsyncpa [#allocation12], 1 }
 0xb9f   :  { %1643 = vsyncpa [#allocation15], 1 }
 0xba0   :  { %1644 = vsyncpa [#allocation18], 1 }
 0xba1   :  { %1645 = vsyncpa [#allocation21], 1 }
 0xba2   :  { %1646 = vsyncpa [#allocation24], 1 }
 0xba3   :  { %1647 = vsyncpa [#allocation27], 1 }
 0xba4   :  { %1648 = vsyncpa [#allocation30], 1 }
 0xba5   :  { %1649 = vsyncpa [#allocation33], 1 }
 0xba6   :  { %1650 = vsyncpa [#allocation4], 1 }
 0xba7   :  { %1652 = vsyncpa [#allocation4 + $0x1], 1 }

</bundles_post_ra>
